<compile_context>
chip_gen: v7x
topology: tpu7x:2x2x1
jax: 0.10.0
libtpu: 0.0.40
codegen_flags: <defaults>
</compile_context>

<pallas_src>
import jax
import jax.numpy as jnp
from jax import lax
from jax.experimental import pallas as pl
from jax.experimental.pallas import tpu as pltpu

# ---- model dimensions (match the module semantics) -------------------------
N_BATCH = 2            # small batch
C_IN = 3               # RGB input
PATCH = 4              # stub backbone patch size / stride
H_FEAT = 10            # feature map spatial size (MaxPool2d kernel_size=10 -> 1x1)
W_FEAT = 10
HW = H_FEAT * W_FEAT
C_FEAT = 1024          # DenseNet121 feature channels (Linear in_features=1024)
N_CLASSES = 14         # Linear out_features=14
K_PATCH = C_IN * PATCH * PATCH
H_IN = H_FEAT * PATCH
W_IN = W_FEAT * PATCH


# ---------------------------------------------------------------------------
# Fused kernel: one grid step == one batch sample, fully resident in VMEM.
#   backbone matmul (MXU, bf16 x bf16 -> f32) -> ReLU (VPU) ->
#   sublane max-pool (VPU) -> classifier matmul (MXU) -> sigmoid (EUP/VPU)
# ---------------------------------------------------------------------------
def agcnn_fused_kernel(xkp_ref, xpk_ref, wck_ref, wkc_ref, wo_ref, b_ref,
                       out_ref, fmap_ref, pool_ref):
    # xkp_ref : (1, K, HW)    bf16  patch pixels, K-major (for NCHW fmap matmul)
    # xpk_ref : (1, HW, K)    bf16  patch pixels, HW-major (for pool matmul)
    # wck_ref : (C, K)        bf16  stub backbone weight, channels-first
    # wkc_ref : (K, C)        bf16  same weight, channels-last (lane-dense C)
    # wo_ref  : (CLS, C)      f32   classifier weight (PyTorch Linear layout)
    # b_ref   : (1, CLS)      f32   classifier bias (row)
    # out_ref : (1, 1, CLS)   f32   sigmoid(logits)               (lane-dense)
    # fmap_ref: (1, C, HW)    f32   relu'd feature map, NCHW-flat
    # pool_ref: (1, 1, C)     f32   global 10x10 max pool          (lane-dense)

    # --- feature map in NCHW-flat orientation, stored directly ------------
    f_chw = jnp.dot(wck_ref[...], xkp_ref[0],
                    preferred_element_type=jnp.float32)           # (C, HW)
    fmap_ref[0] = jnp.maximum(f_chw, 0.0)                         # ReLU + store

    # --- same (tiny) matmul in (HW, C) orientation: pool reduce runs on the
    # --- sublane axis (VPU), pooled comes out as a lane-dense row ---------
    f_hwc = jnp.dot(xpk_ref[0], wkc_ref[...],
                    preferred_element_type=jnp.float32)           # (HW, C)
    f_hwc = jnp.maximum(f_hwc, 0.0)                               # ReLU
    pooled = jnp.max(f_hwc, axis=0, keepdims=True)                # (1, C) row
    pool_ref[0] = pooled                                          # out_pooling

    # --- classifier: contract 1024 axis of pooled against axis 1 of wo ----
    logits = lax.dot_general(
        pooled, wo_ref[...],
        dimension_numbers=(((1,), (1,)), ((), ())),
        preferred_element_type=jnp.float32) + b_ref[...]          # (1, CLS)
    out_ref[0] = 1.0 / (1.0 + jnp.exp(-logits))                   # Sigmoid


# ---------------------------------------------------------------------------
# Wrapper
# ---------------------------------------------------------------------------
def _extract_patches(x):
    """(N, C_IN, H_IN, W_IN) -> ((N, K, HW), (N, HW, K)) bf16 patch pixels."""
    n = x.shape[0]
    xp = x.reshape(n, C_IN, H_FEAT, PATCH, W_FEAT, PATCH).astype(jnp.bfloat16)
    xp_khw = xp.transpose(0, 1, 3, 5, 2, 4).reshape(n, K_PATCH, HW)
    xp_hwk = xp.transpose(0, 2, 4, 1, 3, 5).reshape(n, HW, K_PATCH)
    return xp_khw, xp_hwk


def agcnn_forward(x, w_embed, w_out, b_out):
    """x: (N, C_IN, H_IN, W_IN) f32 NCHW.  w_embed: (C_FEAT, K_PATCH) bf16.
    w_out: (N_CLASSES, C_FEAT) f32 (PyTorch Linear layout).  b_out: (N_CLASSES,)."""
    n = x.shape[0]
    xp_khw, xp_hwk = _extract_patches(x)         # tiny (~20 KiB) glue, bf16
    w_ck = w_embed                               # (C, K)
    w_kc = w_embed.T                             # (K, C) — one-time 96 KiB transpose
    b_row = b_out.reshape(1, N_CLASSES)

    out_row, fmap_flat, pool_row = pl.pallas_call(
        agcnn_fused_kernel,
        out_shape=(
            jax.ShapeDtypeStruct((n, 1, N_CLASSES), jnp.float32),   # out (row)
            jax.ShapeDtypeStruct((n, C_FEAT, HW), jnp.float32),     # feature_map (NCHW flat)
            jax.ShapeDtypeStruct((n, 1, C_FEAT), jnp.float32),      # out_pooling (row)
        ),
        grid_spec=pltpu.PrefetchScalarGridSpec(
            num_scalar_prefetch=0,
            grid=(n,),
            in_specs=[
                pl.BlockSpec((1, K_PATCH, HW), lambda i: (i, 0, 0)),
                pl.BlockSpec((1, HW, K_PATCH), lambda i: (i, 0, 0)),
                pl.BlockSpec((C_FEAT, K_PATCH), lambda i: (0, 0)),
                pl.BlockSpec((K_PATCH, C_FEAT), lambda i: (0, 0)),
                pl.BlockSpec((N_CLASSES, C_FEAT), lambda i: (0, 0)),
                pl.BlockSpec((1, N_CLASSES), lambda i: (0, 0)),
            ],
            out_specs=[
                pl.BlockSpec((1, 1, N_CLASSES), lambda i: (i, 0, 0)),
                pl.BlockSpec((1, C_FEAT, HW), lambda i: (i, 0, 0)),
                pl.BlockSpec((1, 1, C_FEAT), lambda i: (i, 0, 0)),
            ],
        ),
        compiler_params=pltpu.CompilerParams(
            dimension_semantics=("parallel",)),
    )(xp_khw, xp_hwk, w_ck, w_kc, w_out, b_row)

    # all of these reshapes are free (no data movement)
    out = out_row.reshape(n, N_CLASSES)
    feature_map = fmap_flat.reshape(n, C_FEAT, H_FEAT, W_FEAT)
    out_pooling = pool_row.reshape(n, C_FEAT, 1, 1)
    return out, feature_map, out_pooling


# ---------------------------------------------------------------------------
# Pure-JAX reference of the same computation (for correctness check)
# ---------------------------------------------------------------------------
def agcnn_reference(x, w_embed, w_out, b_out):
    n = x.shape[0]
    xp_khw, _ = _extract_patches(x)                               # (n, K, HW) bf16
    fmap = jnp.einsum('ck,nkp->ncp', w_embed, xp_khw,
                      preferred_element_type=jnp.float32)         # (n, C, HW)
    fmap = jnp.maximum(fmap, 0.0)
    pooled = jnp.max(fmap, axis=2)                                # (n, C)
    logits = pooled @ w_out.T + b_out[None, :]
    out = 1.0 / (1.0 + jnp.exp(-logits))
    feature_map = fmap.reshape(n, C_FEAT, H_FEAT, W_FEAT)
    out_pooling = pooled.reshape(n, C_FEAT, 1, 1)
    return out, feature_map, out_pooling


if __name__ == "__main__":
    key = jax.random.PRNGKey(0)
    k_x, k_we, k_wo, k_bo = jax.random.split(key, 4)

    # deterministic synthetic inputs / parameters (shapes from the module)
    x = jax.random.normal(k_x, (N_BATCH, C_IN, H_IN, W_IN), dtype=jnp.float32)
    w_embed = (jax.random.normal(
        k_we, (C_FEAT, K_PATCH), dtype=jnp.float32) * 0.05).astype(jnp.bfloat16)
    w_out = jax.random.normal(
        k_wo, (N_CLASSES, C_FEAT), dtype=jnp.float32) * 0.02
    b_out = jax.random.normal(k_bo, (N_CLASSES,), dtype=jnp.float32) * 0.01

    fwd = jax.jit(agcnn_forward)
    out, feature_map, out_pooling = jax.block_until_ready(
        fwd(x, w_embed, w_out, b_out))

    # sanity check against the pure-JAX reference
    ref_out, ref_fm, ref_pool = agcnn_reference(x, w_embed, w_out, b_out)
    assert out.shape == (N_BATCH, N_CLASSES)
    assert feature_map.shape == (N_BATCH, C_FEAT, H_FEAT, W_FEAT)
    assert out_pooling.shape == (N_BATCH, C_FEAT, 1, 1)
    assert jnp.allclose(out, ref_out, atol=1e-5)
    assert jnp.allclose(feature_map, ref_fm, atol=1e-4)
    assert jnp.allclose(out_pooling, ref_pool, atol=1e-4)

    print("KERNEL_OK")
</pallas_src>

<mosaic_0001>
module attributes {stable_mosaic.version = 11 : i64} {
  func.func @agcnn_fused_kernel(%arg0: i32, %arg1: memref<1x48x100xbf16, #tpu.memory_space<vmem>>, %arg2: memref<1x100x48xbf16, #tpu.memory_space<vmem>>, %arg3: memref<1024x48xbf16, #tpu.memory_space<vmem>>, %arg4: memref<48x1024xbf16, #tpu.memory_space<vmem>>, %arg5: memref<14x1024xf32, #tpu.memory_space<vmem>>, %arg6: memref<1x14xf32, #tpu.memory_space<vmem>>, %arg7: memref<1x1x14xf32, #tpu.memory_space<vmem>>, %arg8: memref<1x1024x100xf32, #tpu.memory_space<vmem>>, %arg9: memref<1x1x1024xf32, #tpu.memory_space<vmem>>) attributes {dimension_semantics = [#tpu.dimension_semantics<parallel>], iteration_bounds = array<i64: 2>, scalar_prefetch = 0 : i64, scratch_operands = 0 : i64, tpu.core_type = #tpu.core_type<tc>, window_params = [{transform_indices = @transform_0, window_bounds = array<i64: 1, 48, 100>}, {transform_indices = @transform_1, window_bounds = array<i64: 1, 100, 48>}, {pipeline_mode = #tpu.pipeline_mode<synchronous>, transform_indices = @transform_2, window_bounds = array<i64: 1024, 48>}, {pipeline_mode = #tpu.pipeline_mode<synchronous>, transform_indices = @transform_3, window_bounds = array<i64: 48, 1024>}, {pipeline_mode = #tpu.pipeline_mode<synchronous>, transform_indices = @transform_4, window_bounds = array<i64: 14, 1024>}, {pipeline_mode = #tpu.pipeline_mode<synchronous>, transform_indices = @transform_5, window_bounds = array<i64: 1, 14>}, {transform_indices = @transform_6, window_bounds = array<i64: 1, 1, 14>}, {transform_indices = @transform_7, window_bounds = array<i64: 1, 1024, 100>}, {transform_indices = @transform_8, window_bounds = array<i64: 1, 1, 1024>}]} {
    %c0 = arith.constant 0 : index
    %c0_0 = arith.constant 0 : index
    %0 = vector.load %arg3[%c0, %c0_0] : memref<1024x48xbf16, #tpu.memory_space<vmem>>, vector<1024x48xbf16>
    %c0_1 = arith.constant 0 : index
    %c0_2 = arith.constant 0 : index
    %c0_3 = arith.constant 0 : index
    %1 = vector.load %arg1[%c0_1, %c0_2, %c0_3] : memref<1x48x100xbf16, #tpu.memory_space<vmem>>, vector<1x48x100xbf16>
    %2 = vector.shape_cast %1 : vector<1x48x100xbf16> to vector<48x100xbf16>
    %cst = arith.constant dense<0.000000e+00> : vector<1024x100xf32>
    %3 = tpu.matmul %0, %2, %cst {dimension_numbers = #tpu.dot_dimension_numbers<[1], [0], [0], [1], [0, 0, 1, 1], [], []>} : vector<1024x48xbf16>, vector<48x100xbf16>, vector<1024x100xf32> -> vector<1024x100xf32>
    %cst_4 = arith.constant 0.000000e+00 : f32
    %4 = vector.broadcast %cst_4 : f32 to vector<1024x100xf32>
    %5 = arith.maximumf %3, %4 : vector<1024x100xf32>
    %c0_5 = arith.constant 0 : index
    %c0_6 = arith.constant 0 : index
    %c0_7 = arith.constant 0 : index
    %6 = vector.load %arg8[%c0_5, %c0_6, %c0_7] : memref<1x1024x100xf32, #tpu.memory_space<vmem>>, vector<1x1024x100xf32>
    %7 = vector.shape_cast %6 : vector<1x1024x100xf32> to vector<1024x100xf32>
    %8 = vector.shape_cast %5 : vector<1024x100xf32> to vector<1x1024x100xf32>
    tpu.vector_store %arg8[%c0_5, %c0_6, %c0_7], %8 {strides = array<i32>} : memref<1x1024x100xf32, #tpu.memory_space<vmem>>, vector<1x1024x100xf32>,
    %c0_8 = arith.constant 0 : index
    %c0_9 = arith.constant 0 : index
    %c0_10 = arith.constant 0 : index
    %9 = vector.load %arg2[%c0_8, %c0_9, %c0_10] : memref<1x100x48xbf16, #tpu.memory_space<vmem>>, vector<1x100x48xbf16>
    %10 = vector.shape_cast %9 : vector<1x100x48xbf16> to vector<100x48xbf16>
    %c0_11 = arith.constant 0 : index
    %c0_12 = arith.constant 0 : index
    %11 = vector.load %arg4[%c0_11, %c0_12] : memref<48x1024xbf16, #tpu.memory_space<vmem>>, vector<48x1024xbf16>
    %cst_13 = arith.constant dense<0.000000e+00> : vector<100x1024xf32>
    %12 = tpu.matmul %10, %11, %cst_13 {dimension_numbers = #tpu.dot_dimension_numbers<[1], [0], [0], [1], [0, 0, 1, 1], [], []>} : vector<100x48xbf16>, vector<48x1024xbf16>, vector<100x1024xf32> -> vector<100x1024xf32>
    %cst_14 = arith.constant 0.000000e+00 : f32
    %13 = vector.broadcast %cst_14 : f32 to vector<100x1024xf32>
    %14 = arith.maximumf %12, %13 : vector<100x1024xf32>
    %cst_15 = arith.constant dense<0xFF800000> : vector<1024xf32>
    %15 = vector.multi_reduction <maximumf>, %14, %cst_15 [0] : vector<100x1024xf32> to vector<1024xf32>
    %16 = vector.shape_cast %15 : vector<1024xf32> to vector<1x1024xf32>
    %c0_16 = arith.constant 0 : index
    %c0_17 = arith.constant 0 : index
    %c0_18 = arith.constant 0 : index
    %17 = vector.load %arg9[%c0_16, %c0_17, %c0_18] : memref<1x1x1024xf32, #tpu.memory_space<vmem>>, vector<1x1x1024xf32>
    %18 = vector.shape_cast %17 : vector<1x1x1024xf32> to vector<1x1024xf32>
    %19 = vector.shape_cast %16 : vector<1x1024xf32> to vector<1x1x1024xf32>
    tpu.vector_store %arg9[%c0_16, %c0_17, %c0_18], %19 {strides = array<i32>} : memref<1x1x1024xf32, #tpu.memory_space<vmem>>, vector<1x1x1024xf32>,
    %c0_19 = arith.constant 0 : index
    %c0_20 = arith.constant 0 : index
    %20 = vector.load %arg5[%c0_19, %c0_20] : memref<14x1024xf32, #tpu.memory_space<vmem>>, vector<14x1024xf32>
    %cst_21 = arith.constant dense<0.000000e+00> : vector<1x14xf32>
    %21 = tpu.matmul %16, %20, %cst_21 {dimension_numbers = #tpu.dot_dimension_numbers<[1], [1], [0], [0], [0, 0, 1, 0], [], []>} : vector<1x1024xf32>, vector<14x1024xf32>, vector<1x14xf32> -> vector<1x14xf32>
    %c0_22 = arith.constant 0 : index
    %c0_23 = arith.constant 0 : index
    %22 = vector.load %arg6[%c0_22, %c0_23] : memref<1x14xf32, #tpu.memory_space<vmem>>, vector<1x14xf32>
    %23 = arith.addf %21, %22 : vector<1x14xf32>
    %cst_24 = arith.constant 0.000000e+00 : f32
    %24 = vector.broadcast %cst_24 : f32 to vector<1x14xf32>
    %25 = arith.subf %24, %23 : vector<1x14xf32>
    %26 = math.exp %25 : vector<1x14xf32>
    %cst_25 = arith.constant 1.000000e+00 : f32
    %27 = vector.broadcast %cst_25 : f32 to vector<1x14xf32>
    %28 = arith.addf %27, %26 : vector<1x14xf32>
    %cst_26 = arith.constant 1.000000e+00 : f32
    %29 = vector.broadcast %cst_26 : f32 to vector<1x14xf32>
    %30 = arith.divf %29, %28 : vector<1x14xf32>
    %c0_27 = arith.constant 0 : index
    %c0_28 = arith.constant 0 : index
    %c0_29 = arith.constant 0 : index
    %31 = vector.load %arg7[%c0_27, %c0_28, %c0_29] : memref<1x1x14xf32, #tpu.memory_space<vmem>>, vector<1x1x14xf32>
    %32 = vector.shape_cast %31 : vector<1x1x14xf32> to vector<1x14xf32>
    %33 = vector.shape_cast %30 : vector<1x14xf32> to vector<1x1x14xf32>
    tpu.vector_store %arg7[%c0_27, %c0_28, %c0_29], %33 {strides = array<i32>} : memref<1x1x14xf32, #tpu.memory_space<vmem>>, vector<1x1x14xf32>,
    return
  }
  func.func @transform_0(%arg0: i32) -> (i32, i32, i32) {
    %c0_i32 = arith.constant 0 : i32
    %c0_i32_0 = arith.constant 0 : i32
    %c0_i32_1 = arith.constant 0 : i32
    return %arg0, %c0_i32, %c0_i32_0 : i32, i32, i32
  }
  func.func @transform_1(%arg0: i32) -> (i32, i32, i32) {
    %c0_i32 = arith.constant 0 : i32
    %c0_i32_0 = arith.constant 0 : i32
    %c0_i32_1 = arith.constant 0 : i32
    return %arg0, %c0_i32, %c0_i32_0 : i32, i32, i32
  }
  func.func @transform_2(%arg0: i32) -> (i32, i32) {
    %c0_i32 = arith.constant 0 : i32
    %c0_i32_0 = arith.constant 0 : i32
    %c0_i32_1 = arith.constant 0 : i32
    return %c0_i32, %c0_i32_0 : i32, i32
  }
  func.func @transform_3(%arg0: i32) -> (i32, i32) {
    %c0_i32 = arith.constant 0 : i32
    %c0_i32_0 = arith.constant 0 : i32
    %c0_i32_1 = arith.constant 0 : i32
    return %c0_i32, %c0_i32_0 : i32, i32
  }
  func.func @transform_4(%arg0: i32) -> (i32, i32) {
    %c0_i32 = arith.constant 0 : i32
    %c0_i32_0 = arith.constant 0 : i32
    %c0_i32_1 = arith.constant 0 : i32
    return %c0_i32, %c0_i32_0 : i32, i32
  }
  func.func @transform_5(%arg0: i32) -> (i32, i32) {
    %c0_i32 = arith.constant 0 : i32
    %c0_i32_0 = arith.constant 0 : i32
    %c0_i32_1 = arith.constant 0 : i32
    return %c0_i32, %c0_i32_0 : i32, i32
  }
  func.func @transform_6(%arg0: i32) -> (i32, i32, i32) {
    %c0_i32 = arith.constant 0 : i32
    %c0_i32_0 = arith.constant 0 : i32
    %c0_i32_1 = arith.constant 0 : i32
    return %arg0, %c0_i32, %c0_i32_0 : i32, i32, i32
  }
  func.func @transform_7(%arg0: i32) -> (i32, i32, i32) {
    %c0_i32 = arith.constant 0 : i32
    %c0_i32_0 = arith.constant 0 : i32
    %c0_i32_1 = arith.constant 0 : i32
    return %arg0, %c0_i32, %c0_i32_0 : i32, i32, i32
  }
  func.func @transform_8(%arg0: i32) -> (i32, i32, i32) {
    %c0_i32 = arith.constant 0 : i32
    %c0_i32_0 = arith.constant 0 : i32
    %c0_i32_1 = arith.constant 0 : i32
    return %arg0, %c0_i32, %c0_i32_0 : i32, i32, i32
  }
}

</mosaic_0001>

<bundles_post_ra>
// kernel: agcnn_forward.1
= control target key start
LH: loop header
LB: loop body
LE: loop exit
PB: predicated region body
PF: predicated region fallthrough
CT: control target
= control target key end

     0   :  { %14 = vsyncpa [#allocation3], 0  ;;  %s4851_s0 = inlined_call_operand.vmem [shape: bf16[2,48,100], index: 0, kind: input, shape index: {}]   ;;  %s4852_s1 = inlined_call_operand.vmem [shape: bf16[2,100,48], index: 1, kind: input, shape index: {}]   ;;  %s4853_s2 = inlined_call_operand.vmem [shape: bf16[1024,48], index: 2, kind: input, shape index: {}]   ;;  %s4854_s3 = inlined_call_operand.vmem [shape: bf16[48,1024], index: 3, kind: input, shape index: {}]   ;;  %s4855_s4 = inlined_call_operand.vmem [shape: f32[14,1024], index: 4, kind: input, shape index: {}]   ;;  %s4856_s5 = inlined_call_operand.vmem [shape: f32[1,14], index: 5, kind: input, shape index: {}]   ;;  %s4857_s6 = inlined_call_operand.hbm [shape: f32[2,1,14], index: 6, kind: output, shape index: {0}]   ;;  %s4858_s7 = inlined_call_operand.vmem [shape: f32[2,1024,100], index: 7, kind: output, shape index: {1}]   ;;  %s4859_s8 = inlined_call_operand.hbm [shape: f32[2,1,1024], index: 8, kind: output, shape index: {2}]  }
   0x1   :  { %16 = vsyncpa [#allocation3 + $0x1], 0 }
   0x2   :  { %17 = vsyncpa [#allocation5], 0 }
   0x3   :  { %19 = vsyncpa [#allocation5 + $0x1], 0  ;;  %s3916_s27 = smov 0   ;;  %s3918_s28 = smov 0  }
   0x4   :  { %s3920_s29 = smov 0   ;;  %s3922_s30 = smov 0  }
   0x5 LB: > { %s3937_s9 = sadd.s32 4294967295, %s3865_s30   ;;  %s3214_s10 = sadd.s32 4294967294, %s3865_s30   ;;  %s3865_s30 = sphi %s3922_s30, %s4865_s30   ;;  %s3861_s29 = sphi %s3920_s29, %s4864_s29   ;;  %s3857_s28 = sphi %s3918_s28, %s4863_s28   ;;  %s3853_s27 = sphi %s3916_s27, %s4862_s27  }
   0x6   : > { %s3941_s11 = sadd.s32 1, %s3865_s30   ;;  %s168_s12 = sadd.s32 1, %s3861_s29 }
   0x7   : > { %s165_s13 = ssub.s32 %s3865_s30, %s3941_s11  ;;  %p178_p0 = scmp.ne.s32.totalorder %s3861_s29, %s3857_s28 }
   0x8   : > { %p166_p1 = scmp.eq.s32.totalorder %s165_s13, 0  ;;  %p179_p2 = scmp.eq.s32.totalorder %s3937_s9, 1 }
   0x9   : > { %p184_p3 = scmp.ne.s32.totalorder %s3857_s28, %s3853_s27  ;;  %p185_p4 = scmp.eq.s32.totalorder %s3214_s10, 1 }
   0xa   : > { %s3952_s14 = scalar_select %p166_p1, %s3861_s29, %s168_s12  }
   0xb   : > { %p3954_p5 = por %p179_p2, %p178_p0  ;;  %p3958_p6 = por %p185_p4, %p184_p3 }
   0xc   : > { %p3217_p7 = scmp.ge.s32.totalorder %s3865_s30, 1  ;;  %p283_p8 = scmp.lt.s32.totalorder %s3865_s30, 3 }
   0xe   : > { %p284_p9 = pnand %p3217_p7, %p283_p8 }
   0xf   : > { %v1827_v0 = vld [vmem:[%s4854_s3] sm:$0xff] (!%p284_p9)  ;;  %p331_p10 = scmp.lt.s32.totalorder (!%p284_p9), %s3937_s9, 1  ;;  %v3867_v6 = vmov (!%p284_p9), 0   ;;  %v1828_v12 = vld [vmem:[%s4854_s3 + $0x8] sm:$0xff] (!%p284_p9)  ;;  %vm819_vm0 = vcmask (!%p284_p9), 392192   ;;  %v1829_v24 = vld [vmem:[%s4854_s3 + $0x10] sm:$0xff] (!%p284_p9) }
  0x10   : > { %287 = sbr.rel (%p284_p9) target bundleno = 734 (0x2de), region = 44  ;;  %v1831_v1 = vld [vmem:[%s4854_s3 + $0x20] sm:$0xff] (!%p284_p9)  ;;  %2057 = vmatprep.mubr.bf16.mxu1 (!%p284_p9), %v3867_v6  ;;  %v1832_v13 = vld [vmem:[%s4854_s3 + $0x28] sm:$0xff] (!%p284_p9)  ;;  %v1833_v25 = vld [vmem:[%s4854_s3 + $0x30] sm:$0xff] (!%p284_p9)  ;;  %vm2544_vm1 = vcmask (!%p284_p9), 1043456   ;;  %vm1685_vm2 = vcmask (!%p284_p9), 818176  }
  0x11   : > { %v1835_v2 = vld [vmem:[%s4854_s3 + $0x40] sm:$0xff] (!%p284_p9)  ;;  %v3362_v3 = vcombine.high (!%p284_p9), %v1827_v0, %v1831_v1  ;;  %v3361_v4 = vcombine.low (!%p284_p9), %v1827_v0, %v1831_v1  ;;  %v3364_v15 = vcombine.high (!%p284_p9), %v1828_v12, %v1832_v13  ;;  %v1836_v16 = vld [vmem:[%s4854_s3 + $0x48] sm:$0xff] (!%p284_p9)  ;;  %v3363_v19 = vcombine.low (!%p284_p9), %v1828_v12, %v1832_v13  ;;  %v1837_v35 = vld [vmem:[%s4854_s3 + $0x50] sm:$0xff] (!%p284_p9)  ;;  %s4647_s21 = sand.u32 (!%p284_p9), 1, %s3857_s28   ;;  %s3420_s24 = sshll.u32 (!%p284_p9), %s3937_s9, 7 }
  0x12   : > { %v1839_v5 = vld [vmem:[%s4854_s3 + $0x60] sm:$0xff] (!%p284_p9)  ;;  %v1840_v17 = vld [vmem:[%s4854_s3 + $0x68] sm:$0xff] (!%p284_p9)  ;;  %v3366_v29 = vcombine.high (!%p284_p9), %v1829_v24, %v1833_v25  ;;  %v1841_v36 = vld [vmem:[%s4854_s3 + $0x70] sm:$0xff] (!%p284_p9)  ;;  %v3365_v37 = vcombine.low (!%p284_p9), %v1829_v24, %v1833_v25  ;;  %s3869_s19 = smov (!%p284_p9), [#allocation4]  }
  0x13   : > { %v3370_v7 = vcombine.high (!%p284_p9), %v1835_v2, %v1839_v5  ;;  %v1843_v8 = vld [vmem:[%s4854_s3 + $0x80] sm:$0xff] (!%p284_p9)  ;;  %2025 = vmatprep.subr.bf16.mxu1 (!%p284_p9), %v3362_v3  ;;  %v3369_v10 = vcombine.low (!%p284_p9), %v1835_v2, %v1839_v5  ;;  %v3372_v20 = vcombine.high (!%p284_p9), %v1836_v16, %v1840_v17  ;;  %v1844_v21 = vld [vmem:[%s4854_s3 + $0x88] sm:$0xff] (!%p284_p9)  ;;  %v3371_v23 = vcombine.low (!%p284_p9), %v1836_v16, %v1840_v17  ;;  %v1845_v39 = vld [vmem:[%s4854_s3 + $0x90] sm:$0xff] (!%p284_p9) }
  0x14   : > { %v1847_v9 = vld [vmem:[%s4854_s3 + $0xa0] sm:$0xff] (!%p284_p9)  ;;  %2026 = vmatpush1.bf16.msra.mxu1 (!%p284_p9), %v3361_v4  ;;  %v1848_v22 = vld [vmem:[%s4854_s3 + $0xa8] sm:$0xff] (!%p284_p9)  ;;  %v3374_v38 = vcombine.high (!%p284_p9), %v1837_v35, %v1841_v36  ;;  %v1849_v40 = vld [vmem:[%s4854_s3 + $0xb0] sm:$0xff] (!%p284_p9)  ;;  %v3373_v41 = vcombine.low (!%p284_p9), %v1837_v35, %v1841_v36 }
  0x15   : > { %2027 = vmatprep.subr.bf16.mxu1 (!%p284_p9), %v3370_v7  ;;  %v3378_v11 = vcombine.high (!%p284_p9), %v1843_v8, %v1847_v9  ;;  %v3377_v14 = vcombine.low (!%p284_p9), %v1843_v8, %v1847_v9  ;;  %v3380_v27 = vcombine.high (!%p284_p9), %v1844_v21, %v1848_v22  ;;  %v3379_v28 = vcombine.low (!%p284_p9), %v1844_v21, %v1848_v22  ;;  %v1830_v43 = vld [vmem:[%s4854_s3 + $0x18] sm:$0xff] (!%p284_p9)  ;;  %v3703_v50 = vld [vmem:[%s4853_s2] sm:$0xff] (!%p284_p9)   ;;  %v3704_v51 = vld [vmem:[%s4853_s2 + $0x8] sm:$0xff] (!%p284_p9)  }
  0x16   : > { %v3382_v42 = vcombine.high (!%p284_p9), %v1845_v39, %v1849_v40  ;;  %v1834_v44 = vld [vmem:[%s4854_s3 + $0x38] sm:$0xff] (!%p284_p9)  ;;  %v3381_v45 = vcombine.low (!%p284_p9), %v1845_v39, %v1849_v40  ;;  %3494 = vmatprep.mubr.msk.bf16.mxu0 (!%p284_p9), %vm819_vm0, %v3703_v50  ;;  %v3705_v52 = vld [vmem:[%s4853_s2 + $0x10] sm:$0xff] (!%p284_p9)   ;;  %v3707_v56 = vld [vmem:[%s4853_s2 + $0x20] sm:$0xff] (!%p284_p9)  }
  0x17   : > { %s3985_s13 = scalar_select %p331_p10, %s3937_s9, 1  ;;  %v3368_v46 = vcombine.high %v1830_v43, %v1834_v44  ;;  %v3706_v53 = vld [vmem:[%s4853_s2 + $0x18] sm:$0xff]   ;;  %v3708_v57 = vld [vmem:[%s4853_s2 + $0x28] sm:$0xff]   ;;  %v3367_v58 = vcombine.low %v1830_v43, %v1834_v44  ;;  %v3709_v0 = vld [vmem:[%s4853_s2 + $0x30] sm:$0xff]  }
  0x18   : > { %2028 = vmatpush1.bf16.msra.mxu1 %v3369_v10  ;;  %v1838_v54 = vld [vmem:[%s4854_s3 + $0x58] sm:$0xff]  ;;  %v3711_v3 = vld [vmem:[%s4853_s2 + $0x40] sm:$0xff]   ;;  %v3712_v4 = vld [vmem:[%s4853_s2 + $0x48] sm:$0xff]  }
  0x19   : > { %s3646_s17 = smul.u32 52, %s3985_s13  ;;  %2029 = vmatprep.subr.bf16.mxu1 %v3378_v11  ;;  %v1842_v55 = vld [vmem:[%s4854_s3 + $0x78] sm:$0xff]  ;;  %v3713_v5 = vld [vmem:[%s4853_s2 + $0x50] sm:$0xff]   ;;  %v3715_v8 = vld [vmem:[%s4853_s2 + $0x60] sm:$0xff]   ;;  %s3419_s22 = sshll.u32 %s3985_s13, 10 }
  0x1a   : > { %s3645_s26 = smul.u32 24, %s3985_s13  ;;  %v3376_v59 = vcombine.high %v1838_v54, %v1842_v55  ;;  %v1846_v60 = vld [vmem:[%s4854_s3 + $0x98] sm:$0xff]  ;;  %v3375_v62 = vcombine.low %v1838_v54, %v1842_v55  ;;  %v3716_v9 = vld [vmem:[%s4853_s2 + $0x68] sm:$0xff]   ;;  %v3717_v13 = vld [vmem:[%s4853_s2 + $0x70] sm:$0xff]   ;;  %s4418_s10 = scalar_lea.vmem %s4858_s7, %s3419_s22 }
  0x1b   : > { %s3991_s20 = scalar_lea.vmem %s4852_s1, %s3646_s17  ;;  %v1850_v61 = vld [vmem:[%s4854_s3 + $0xb8] sm:$0xff]  ;;  %v2746_v10 = vld [vmem:[%s4855_s4 + $0x8] sm:$0xff]  ;;  %v2745_v17 = vld [vmem:[%s4855_s4] sm:$0xff]  ;;  %s3218_s22 = sshll.u32 %s4647_s21, 3 }
  0x1c   : > { %v4006_v18 = vld [vmem:[%s3991_s20] sm:$0xff]   ;;  %2030 = vmatpush1.bf16.msra.mxu1 %v3377_v14  ;;  %v4024_v26 = vld [vmem:[%s3991_s20 + $0x8] sm:$0xff]   ;;  %v4030_v30 = vld [vmem:[%s3991_s20 + $0x10] sm:$0xff]   ;;  %s335_s17 = scalar_lea.vmem %s4851_s0, %s3645_s26  ;;  %v3384_v63 = vcombine.high %v1846_v60, %v1850_v61  ;;  %v3383_v2 = vcombine.low %v1846_v60, %v1850_v61  ;;  %s4668_s23 = scalar_lea.vmem [#allocation4], %s3218_s22 }
  0x1d   : > { %2126 = vmatprep.subr.bf16.mxu1 %v3364_v15  ;;  %v4036_v31 = vld [vmem:[%s3991_s20 + $0x18] sm:$0xff]   ;;  %v4042_v32 = vld [vmem:[%s3991_s20 + $0x20] sm:$0xff]   ;;  %v4048_v33 = vld [vmem:[%s3991_s20 + $0x28] sm:$0xff]   ;;  %s3090_s25 = sshll.u32 %s4668_s23, 4  ;;  %s3060_s13 = scalar_lea.sflag [#allocation5], %s4647_s21  ;;  %s3091_s25 = int_to_ptr.vmem [resolvable:$true] %s3090_s25 }
  0x1e   : > { %v4054_v34 = vld [vmem:[%s3991_s20 + $0x30] ss:$0 sps:$4 sm:$0x33]   ;;  %v3700_v47 = vld [vmem:[%s335_s17] sm:$0xff]   ;;  %v3701_v48 = vld [vmem:[%s335_s17 + $0x8] sm:$0xff]   ;;  %s3771_s18 = scalar_lea.vmem %s3091_s25, 128 }
  0x1f   : > { %3385 = vmatmul.mubr.msk.bf16.vlgmr.msra.gmra.mrb[0].mxu1 %vm819_vm0, %v4006_v18  ;;  %3488 = vmatprep.subr.bf16.mxu0 %v3700_v47  ;;  %v3702_v49 = vld [vmem:[%s335_s17 + $0x10] sm:$0xff]   ;;  %v3710_v1 = vld [vmem:[%s4853_s2 + $0x38] sm:$0xff]   ;;  %v2754_v11 = vld [vmem:[%s4855_s4 + $0x48] sm:$0x3f]  ;;  %s4780_s17 = scalar_lea.hbm %s4859_s8, %s3420_s24  ;;  %p3772_p11 = scmp.ne.s32.totalorder %s3091_s25, %s3771_s18 }
  0x20   : > { %2127 = vmatpush1.bf16.msra.mxu1 %v3363_v19  ;;  %2067 = vmatprep.mubr.bf16.mxu1 %v3867_v6  ;;  %v3714_v7 = vld [vmem:[%s4853_s2 + $0x58] sm:$0xff]   ;;  %v3622_v12 = vpack.c.bf16 %v2754_v11, %v2746_v10  ;;  %v3719_v15 = vld [vmem:[%s4853_s2 + $0x80] sm:$0xff]   ;;  %v3720_v16 = vld [vmem:[%s4853_s2 + $0x88] sm:$0xff]   ;;  %s3775_s20 = sshll.u32 %s3869_s19, 4  ;;  %s3776_s20 = int_to_ptr.vmem [resolvable:$false] %s3775_s20 }
  0x21   : > { %2128 = vmatprep.subr.bf16.mxu1 %v3372_v20  ;;  %3489 = vmatpush3.bf16.msra.mxu0 %v3700_v47  ;;  %v3718_v14 = vld [vmem:[%s4853_s2 + $0x78] sm:$0xff]   ;;  %v2753_v19 = vld [vmem:[%s4855_s4 + $0x40] sm:$0x3f]  ;;  %v3721_v20 = vld [vmem:[%s4853_s2 + $0x90] sm:$0xff]   ;;  %p3773_p12 = pnand %p3772_p11, %p3954_p5  ;;  %s3777_s22 = scalar_lea.vmem %s3776_s20, 256 }
  0x22   : > { %3490 = vmatprep.subr.bf16.mxu0 %v3701_v48  ;;  %v3722_v21 = vld [vmem:[%s4853_s2 + $0x98] sm:$0xff]   ;;  %v3624_v22 = vpack.c.bf16 %v2753_v19, %v2745_v17  ;;  %v3724_v24 = vld [vmem:[%s4853_s2 + $0xa8] sm:$0xff]   ;;  %v3731_v36 = vld [vmem:[%s4853_s2 + $0xe0] sm:$0xff]   ;;  %p3778_p0 = scmp.lt.s32.totalorder %s3091_s25, %s3776_s20  ;;  %p3779_p1 = scmp.lt.s32.totalorder %s3777_s22, %s3771_s18 }
  0x23   : > { %v3726_v25 = vld [vmem:[%s4853_s2 + $0xb8] sm:$0xff]   ;;  %v3737_v61 = vld [vmem:[%s4853_s2 + $0x110] sm:$0xff]   ;;  %p3774_p13 = pneg %p3773_p12 }
  0x24   : > { %2129 = vmatpush1.bf16.msra.mxu1 %v3371_v23  ;;  %v3723_v23 = vld [vmem:[%s4853_s2 + $0xa0] sm:$0xff]   ;;  %v2756_v35 = vld [vmem:[%s4855_s4 + $0x58] sm:$0x3f]  ;;  %p3780_p2 = por %p3779_p1, %p3778_p0 }
  0x25   : > { %2130 = vmatprep.subr.bf16.mxu1 %v3380_v27  ;;  %3491 = vmatpush3.bf16.msra.mxu0 %v3701_v48  ;;  %v3728_v27 = vld [vmem:[%s4853_s2 + $0xc8] sm:$0xff]   ;;  %v3734_v40 = vld [vmem:[%s4853_s2 + $0xf8] sm:$0xff]   ;;  %v3735_v48 = vld [vmem:[%s4853_s2 + $0x100] sm:$0xff]  }
  0x26   : > { %3492 = vmatprep.subr.bf16.mxu0 %v3702_v49  ;;  %p3781_p3 = pnand %p3780_p2, %p3774_p13 }
  0x27   : > { %3386 = vmatmul.mubr.msk.bf16.gmra.mrb[4].mxu1 %vm819_vm0, %v4024_v26 }
  0x28   : > { %2077 = vmatprep.mubr.bf16.mxu1 %v3867_v6  ;;  %2131 = vmatpush1.bf16.msra.mxu1 %v3379_v28  ;;  %v3729_v28 = vld [vmem:[%s4853_s2 + $0xd0] sm:$0xff]  }
  0x29   : > { %2227 = vmatprep.subr.bf16.mxu1 %v3366_v29  ;;  %3493 = vmatpush3.bf16.msra.mxu0 %v3702_v49  ;;  %v3730_v29 = vld [vmem:[%s4853_s2 + $0xd8] sm:$0xff]  }
  0x2c   : > { %3495 = vmatmul.mubr.msk.bf16.vlgmr.msra.gmra.mrb[0].mxu0 %vm819_vm0, %v3704_v51  ;;  %v3736_v51 = vld [vmem:[%s4853_s2 + $0x108] sm:$0xff]  }
  0x2d   : > { %3498 = vmatprep.mubr.msk.bf16.mxu0 %vm819_vm0, %v3705_v52 }
  0x2f   : > { %3387 = vmatmul.mubr.msk.bf16.gmra.mrb[8].mxu1 %vm819_vm0, %v4030_v30 }
  0x30   : > { %2087 = vmatprep.mubr.bf16.mxu1 %v3867_v6 }
  0x34   : > { %3499 = vmatmul.mubr.msk.bf16.gmra.mrb[4].mxu0 %vm819_vm0, %v3706_v53 }
  0x35   : > { %3502 = vmatprep.mubr.msk.bf16.mxu0 %vm819_vm0, %v3707_v56 }
  0x37   : > { %3388 = vmatmul.mubr.msk.bf16.gmra.mrb[12].mxu1 %vm819_vm0, %v4036_v31 }
  0x38   : > { %2097 = vmatprep.mubr.bf16.mxu1 %v3867_v6 }
  0x3c   : > { %3503 = vmatmul.mubr.msk.bf16.gmra.mrb[8].mxu0 %vm819_vm0, %v3708_v57 }
  0x3d   : > { %3506 = vmatprep.mubr.msk.bf16.mxu0 %vm819_vm0, %v3709_v0  ;;  %v3738_v0 = vld [vmem:[%s4853_s2 + $0x118] sm:$0xff]  }
  0x3f   : > { %3389 = vmatmul.mubr.msk.bf16.gmra.mrb[16].mxu1 %vm819_vm0, %v4042_v32 }
  0x40   : > { %2107 = vmatprep.mubr.bf16.mxu1 %v3867_v6 }
  0x44   : > { %3507 = vmatmul.mubr.msk.bf16.gmra.mrb[12].mxu0 %vm819_vm0, %v3710_v1 }
  0x45   : > { %3510 = vmatprep.mubr.msk.bf16.mxu0 %vm819_vm0, %v3711_v3 }
  0x47   : > { %3390 = vmatmul.mubr.msk.bf16.gmra.mrb[20].mxu1 %vm819_vm0, %v4048_v33 }
  0x48   : > { %2117 = vmatprep.mubr.bf16.mxu1 %v3867_v6 }
  0x4c   : > { %3511 = vmatmul.mubr.msk.bf16.gmra.mrb[16].mxu0 %vm819_vm0, %v3712_v4 }
  0x4d   : > { %3514 = vmatprep.mubr.msk.bf16.mxu0 %vm819_vm0, %v3713_v5 }
  0x4f   : > { %3391 = vmatmul.mubr.msk.bf16.gmra.mrb[24].mxu1 %vm819_vm0, %v4054_v34 }
  0x50   : > { %2158 = vmatprep.mubr.bf16.mxu1 %v3867_v6 }
  0x54   : > { %3515 = vmatmul.mubr.msk.bf16.gmra.mrb[20].mxu0 %vm819_vm0, %v3714_v7 }
  0x55   : > { %3518 = vmatprep.mubr.msk.bf16.mxu0 %vm819_vm0, %v3715_v8 }
  0x57   : > { %3392 = vmatmul.mubr.msk.bf16.vlgmr.msra.gmra.mrb[28].mxu1 %vm819_vm0, %v4006_v18 }
  0x58   : > { %2228 = vmatpush1.bf16.msra.mxu1 %v3365_v37  ;;  %2168 = vmatprep.mubr.bf16.mxu1 %v3867_v6  ;;  %v3732_v37 = vld [vmem:[%s4853_s2 + $0xe8] sm:$0xff]  }
  0x59   : > { %2229 = vmatprep.subr.bf16.mxu1 %v3374_v38  ;;  %v3733_v38 = vld [vmem:[%s4853_s2 + $0xf0] sm:$0xff]  }
  0x5c   : > { %2230 = vmatpush1.bf16.msra.mxu1 %v3373_v41  ;;  %3519 = vmatmul.mubr.msk.bf16.gmra.mrb[24].mxu0 %vm819_vm0, %v3716_v9 }
  0x5d   : > { %2231 = vmatprep.subr.bf16.mxu1 %v3382_v42  ;;  %3522 = vmatprep.mubr.msk.bf16.mxu0 %vm819_vm0, %v3717_v13 }
  0x5f   : > { %3393 = vmatmul.mubr.msk.bf16.gmra.mrb[32].mxu1 %vm819_vm0, %v4024_v26 }
  0x60   : > { %2178 = vmatprep.mubr.bf16.mxu1 %v3867_v6  ;;  %2232 = vmatpush1.bf16.msra.mxu1 %v3381_v45 }
  0x61   : > { %2328 = vmatprep.subr.bf16.mxu1 %v3368_v46 }
  0x64   : > { %3523 = vmatmul.mubr.msk.bf16.gmra.mrb[28].mxu0 %vm819_vm0, %v3718_v14 }
  0x65   : > { %3526 = vmatprep.mubr.msk.bf16.mxu0 %vm819_vm0, %v3719_v15  ;;  %v3740_v15 = vld [vmem:[%s4853_s2 + $0x128] sm:$0xff]  }
  0x67   : > { %3394 = vmatmul.mubr.msk.bf16.gmra.mrb[36].mxu1 %vm819_vm0, %v4030_v30 }
  0x68   : > { %2188 = vmatprep.mubr.bf16.mxu1 %v3867_v6 }
  0x6c   : > { %3527 = vmatmul.mubr.msk.bf16.gmra.mrb[32].mxu0 %vm819_vm0, %v3720_v16 }
  0x6d   : > { %3530 = vmatprep.mubr.msk.bf16.mxu0 %vm819_vm0, %v3721_v20 }
  0x6f   : > { %3395 = vmatmul.mubr.msk.bf16.gmra.mrb[40].mxu1 %vm819_vm0, %v4036_v31 }
  0x70   : > { %2198 = vmatprep.mubr.bf16.mxu1 %v3867_v6 }
  0x74   : > { %3531 = vmatmul.mubr.msk.bf16.gmra.mrb[36].mxu0 %vm819_vm0, %v3722_v21 }
  0x75   : > { %3534 = vmatprep.mubr.msk.bf16.mxu0 %vm819_vm0, %v3723_v23 }
  0x77   : > { %3396 = vmatmul.mubr.msk.bf16.gmra.mrb[44].mxu1 %vm819_vm0, %v4042_v32 }
  0x78   : > { %2208 = vmatprep.mubr.bf16.mxu1 %v3867_v6 }
  0x7c   : > { %3535 = vmatmul.mubr.msk.bf16.gmra.mrb[40].mxu0 %vm819_vm0, %v3724_v24 }
  0x7f   : > { %3397 = vmatmul.mubr.msk.bf16.gmra.mrb[48].mxu1 %vm819_vm0, %v4048_v33 }
  0x80   : > { %2218 = vmatprep.mubr.bf16.mxu1 %v3867_v6 }
  0x87   : > { %3398 = vmatmul.mubr.msk.bf16.gmra.mrb[52].mxu1 %vm819_vm0, %v4054_v34 }
  0x88   : > { %2259 = vmatprep.mubr.bf16.mxu1 %v3867_v6 }
  0x8f   : > { %3399 = vmatmul.mubr.msk.bf16.vlgmr.msra.gmra.mrb[56].mxu1 %vm819_vm0, %v4006_v18 }
  0x90   : > { %2329 = vmatpush1.bf16.msra.mxu1 %v3367_v58  ;;  %2269 = vmatprep.mubr.bf16.mxu1 %v3867_v6 }
  0x91   : > { %2330 = vmatprep.subr.bf16.mxu1 %v3376_v59 }
  0x94   : > { %2331 = vmatpush1.bf16.msra.mxu1 %v3375_v62 }
  0x95   : > { %2332 = vmatprep.subr.bf16.mxu1 %v3384_v63 }
  0x97   : > { %3400 = vmatmul.mubr.msk.bf16.gmra.mrb[60].mxu1 %vm819_vm0, %v4024_v26 }
  0x98   : > { %2279 = vmatprep.mubr.bf16.mxu1 %v3867_v6  ;;  %2333 = vmatpush1.bf16.msra.mxu1 %v3383_v2 }
  0x99   : > { %3623 = vmatprep.subr.bf16.mxu1 %v3622_v12  ;;  %v3739_v12 = vld [vmem:[%s4853_s2 + $0x120] sm:$0xff]  }
  0x9f   : > { %3401 = vmatmul.mubr.msk.bf16.gmra.mrb[64].mxu1 %vm819_vm0, %v4030_v30 }
  0xa0   : > { %2289 = vmatprep.mubr.bf16.mxu1 %v3867_v6 }
  0xa7   : > { %3402 = vmatmul.mubr.msk.bf16.gmra.mrb[68].mxu1 %vm819_vm0, %v4036_v31 }
  0xa8   : > { %2299 = vmatprep.mubr.bf16.mxu1 %v3867_v6 }
  0xaf   : > { %3403 = vmatmul.mubr.msk.bf16.gmra.mrb[72].mxu1 %vm819_vm0, %v4042_v32 }
  0xb0   : > { %2309 = vmatprep.mubr.bf16.mxu1 %v3867_v6 }
  0xb7   : > { %3404 = vmatmul.mubr.msk.bf16.gmra.mrb[76].mxu1 %vm819_vm0, %v4048_v33 }
  0xb8   : > { %2319 = vmatprep.mubr.bf16.mxu1 %v3867_v6 }
  0xbf   : > { %3405 = vmatmul.mubr.msk.bf16.gmra.mrb[80].mxu1 %vm819_vm0, %v4054_v34 }
  0xc0   : > { %2360 = vmatprep.mubr.bf16.mxu1 %v3867_v6 }
  0xc7   : > { %3406 = vmatmul.mubr.msk.bf16.vlgmr.msra.gmra.mrb[84].mxu1 %vm819_vm0, %v4006_v18  ;;  %v3725_v18 = vld [vmem:[%s4853_s2 + $0xb0] sm:$0xff]  }
  0xc8   : > { %2370 = vmatprep.mubr.bf16.mxu1 %v3867_v6  ;;  %3625 = vmatpush1.bf16.xpose.msra.mxu1 %v3624_v22 }
  0xc9   : > { %3538 = vmatprep.mubr.msk.bf16.mxu0 %vm819_vm0, %v3725_v18 }
  0xca   : > { %3539 = vmatmul.mubr.msk.bf16.gmra.mrb[44].mxu0 %vm819_vm0, %v3726_v25 }
  0xcf   : > { %3407 = vmatmul.mubr.msk.bf16.gmra.mrb[88].mxu1 %vm819_vm0, %v4024_v26  ;;  %v3727_v26 = vld [vmem:[%s4853_s2 + $0xc0] sm:$0xff]  }
  0xd0   : > { %2380 = vmatprep.mubr.bf16.mxu1 %v3867_v6  ;;  %3542 = vmatprep.mubr.msk.bf16.mxu0 %vm819_vm0, %v3727_v26  ;;  %v3741_v26 = vld [vmem:[%s4853_s2 + $0x130] sm:$0xff]  }
  0xd2   : > { %3543 = vmatmul.mubr.msk.bf16.gmra.mrb[48].mxu0 %vm819_vm0, %v3728_v27 }
  0xd3   : > { %3546 = vmatprep.mubr.msk.bf16.mxu0 %vm819_vm0, %v3729_v28 }
  0xd7   : > { %3408 = vmatmul.mubr.msk.bf16.gmra.mrb[92].mxu1 %vm819_vm0, %v4030_v30  ;;  %v2748_v30 = vld [vmem:[%s4855_s4 + $0x18] sm:$0xff] }
  0xd8   : > { %2390 = vmatprep.mubr.bf16.mxu1 %v3867_v6 }
  0xda   : > { %3547 = vmatmul.mubr.msk.bf16.gmra.mrb[52].mxu0 %vm819_vm0, %v3730_v29  ;;  %v3742_v29 = vld [vmem:[%s4853_s2 + $0x138] sm:$0xff]  }
  0xdb   : > { %3550 = vmatprep.mubr.msk.bf16.mxu0 %vm819_vm0, %v3731_v36 }
  0xdf   : > { %3409 = vmatmul.mubr.msk.bf16.gmra.mrb[96].mxu1 %vm819_vm0, %v4036_v31  ;;  %v3626_v31 = vpack.c.bf16 %v2756_v35, %v2748_v30 }
  0xe0   : > { %2400 = vmatprep.mubr.bf16.mxu1 %v3867_v6 }
  0xe1   : > { %3627 = vmatprep.subr.bf16.mxu1 %v3626_v31 }
  0xe2   : > { %3551 = vmatmul.mubr.msk.bf16.gmra.mrb[56].mxu0 %vm819_vm0, %v3732_v37 }
  0xe3   : > { %3554 = vmatprep.mubr.msk.bf16.mxu0 %vm819_vm0, %v3733_v38 }
  0xe7   : > { %3410 = vmatmul.mubr.msk.bf16.gmra.mrb[100].mxu1 %vm819_vm0, %v4042_v32 }
  0xe8   : > { %2410 = vmatprep.mubr.bf16.mxu1 %v3867_v6 }
  0xea   : > { %3555 = vmatmul.mubr.msk.bf16.gmra.mrb[60].mxu0 %vm819_vm0, %v3734_v40 }
  0xeb   : > { %3558 = vmatprep.mubr.msk.bf16.mxu0 %vm819_vm0, %v3735_v48 }
  0xef   : > { %3411 = vmatmul.mubr.msk.bf16.gmra.mrb[104].mxu1 %vm819_vm0, %v4048_v33 }
  0xf0   : > { %2420 = vmatprep.mubr.bf16.mxu1 %v3867_v6 }
  0xf2   : > { %v2059_v32 = vpop.f32.mrb[0].mxu1  ;;  %3559 = vmatmul.mubr.msk.bf16.gmra.mrb[64].mxu0 %vm819_vm0, %v3736_v51 }
  0xf3   : > { %v2061_v39 = vpop.f32.mrb[1].mxu1  ;;  %v2429_v42 = vmax.f32 %v2059_v32, 0.0  ;;  %3562 = vmatprep.mubr.msk.bf16.mxu0 %vm819_vm0, %v3737_v61 }
  0xf4   : > { %v2063_v41 = vpop.f32.mrb[2].mxu1  ;;  %v2430_v33 = vmax.f32 %v2061_v39, 0.0 }
  0xf5   : > { %v2437_v43 = vmax.f32 %v2063_v41, 0.0  ;;  %v2065_v44 = vpop.f32.mrb[3].mxu1 }
  0xf6   : > { %v2438_v6 = vmax.f32 %v2065_v44, 0.0 }
  0xf7   : > { %v2533_v45 = vmax.f32 %v2429_v42, %v2437_v43  ;;  %3412 = vmatmul.mubr.msk.bf16.gmra.mrb[108].mxu1 %vm819_vm0, %v4054_v34  ;;  %v3743_v42 = vld [vmem:[%s4853_s2 + $0x140] sm:$0xff]  }
  0xf8   : > { %v2553_v46 = vmax.f32 %v2430_v33, %v2438_v6  ;;  %v3744_v33 = vld [vmem:[%s4853_s2 + $0x148] sm:$0xff]  }
  0xfa   : > { %v2069_v47 = vpop.f32.mrb[4].mxu1  ;;  %3563 = vmatmul.mubr.msk.bf16.gmra.mrb[68].mxu0 %vm819_vm0, %v3738_v0 }
  0xfb   : > { %v2445_v49 = vmax.f32 %v2069_v47, 0.0  ;;  %v2071_v50 = vpop.f32.mrb[5].mxu1  ;;  %3566 = vmatprep.mubr.msk.bf16.mxu0 %vm819_vm0, %v3739_v12 }
  0xfc   : > { %v2446_v52 = vmax.f32 %v2071_v50, 0.0  ;;  %v2073_v53 = vpop.f32.mrb[6].mxu1 }
  0xfd   : > { %v2534_v54 = vmax.f32 %v2533_v45, %v2445_v49  ;;  %v2453_v55 = vmax.f32 %v2073_v53, 0.0  ;;  %v2075_v56 = vpop.f32.mrb[7].mxu1 }
  0xfe   : > { %v2554_v34 = vmax.f32 %v2553_v46, %v2446_v52  ;;  %v2454_v57 = vmax.f32 %v2075_v56, 0.0 }
  0xff   : > { %v2535_v58 = vmax.f32 %v2534_v54, %v2453_v55  ;;  %v3745_v54 = vld [vmem:[%s4853_s2 + $0x150] sm:$0xff]  }
 0x100   : > { %v2555_v59 = vmax.f32 %v2554_v34, %v2454_v57  ;;  %v3746_v34 = vld [vmem:[%s4853_s2 + $0x158] sm:$0xff]  }
 0x102   : > { %v2079_v60 = vpop.f32.mrb[8].mxu1  ;;  %3567 = vmatmul.mubr.msk.bf16.gmra.mrb[72].mxu0 %vm819_vm0, %v3740_v15 }
 0x103   : > { %v2461_v62 = vmax.f32 %v2079_v60, 0.0  ;;  %v2081_v63 = vpop.f32.mrb[9].mxu1  ;;  %3570 = vmatprep.mubr.msk.bf16.mxu0 %vm819_vm0, %v3741_v26  ;;  %v2758_v26 = vld [vmem:[%s4855_s4 + $0x68] sm:$0x3f] }
 0x104   : > { %v2462_v1 = vmax.f32 %v2081_v63, 0.0  ;;  %v2083_v2 = vpop.f32.mrb[10].mxu1 }
 0x105   : > { %v2536_v3 = vmax.f32 %v2535_v58, %v2461_v62  ;;  %v2469_v4 = vmax.f32 %v2083_v2, 0.0  ;;  %v2085_v5 = vpop.f32.mrb[11].mxu1 }
 0x106   : > { %v2556_v7 = vmax.f32 %v2555_v59, %v2462_v1  ;;  %v2470_v8 = vmax.f32 %v2085_v5, 0.0 }
 0x107   : > { %v2537_v9 = vmax.f32 %v2536_v3, %v2469_v4  ;;  %v3747_v4 = vld [vmem:[%s4853_s2 + $0x160] sm:$0xff]  }
 0x108   : > { %v2557_v10 = vmax.f32 %v2556_v7, %v2470_v8  ;;  %v3748_v8 = vld [vmem:[%s4853_s2 + $0x168] sm:$0xff]  }
 0x10a   : > { %v2089_v11 = vpop.f32.mrb[12].mxu1  ;;  %3571 = vmatmul.mubr.msk.bf16.gmra.mrb[76].mxu0 %vm819_vm0, %v3742_v29  ;;  %v3749_v29 = vld [vmem:[%s4853_s2 + $0x170] sm:$0xff]  }
 0x10b   : > { %v2477_v13 = vmax.f32 %v2089_v11, 0.0  ;;  %v2091_v14 = vpop.f32.mrb[13].mxu1  ;;  %3574 = vmatprep.mubr.msk.bf16.mxu0 %vm819_vm0, %v3743_v42 }
 0x10c   : > { %v2478_v16 = vmax.f32 %v2091_v14, 0.0  ;;  %v2093_v17 = vpop.f32.mrb[14].mxu1 }
 0x10d   : > { %v2538_v19 = vmax.f32 %v2537_v9, %v2477_v13  ;;  %v2485_v20 = vmax.f32 %v2093_v17, 0.0  ;;  %v2095_v21 = vpop.f32.mrb[15].mxu1 }
 0x10e   : > { %v2558_v22 = vmax.f32 %v2557_v10, %v2478_v16  ;;  %v2486_v23 = vmax.f32 %v2095_v21, 0.0 }
 0x10f   : > { %v2539_v24 = vmax.f32 %v2538_v19, %v2485_v20 }
 0x110   : > { %v2559_v18 = vmax.f32 %v2558_v22, %v2486_v23  ;;  %v2747_v23 = vld [vmem:[%s4855_s4 + $0x10] sm:$0xff] }
 0x112   : > { %v2099_v25 = vpop.f32.mrb[16].mxu1  ;;  %3575 = vmatmul.mubr.msk.bf16.gmra.mrb[80].mxu0 %vm819_vm0, %v3744_v33 }
 0x113   : > { %v2493_v27 = vmax.f32 %v2099_v25, 0.0  ;;  %v2101_v28 = vpop.f32.mrb[17].mxu1  ;;  %3578 = vmatprep.mubr.msk.bf16.mxu0 %vm819_vm0, %v3745_v54  ;;  %v2750_v25 = vld [vmem:[%s4855_s4 + $0x28] sm:$0xff] }
 0x114   : > { %v2494_v30 = vmax.f32 %v2101_v28, 0.0  ;;  %v2103_v35 = vpop.f32.mrb[18].mxu1 }
 0x115   : > { %v2540_v31 = vmax.f32 %v2539_v24, %v2493_v27  ;;  %v2501_v36 = vmax.f32 %v2103_v35, 0.0  ;;  %v2105_v37 = vpop.f32.mrb[19].mxu1  ;;  %v2755_v24 = vld [vmem:[%s4855_s4 + $0x50] sm:$0x3f] }
 0x116   : > { %v2560_v32 = vmax.f32 %v2559_v18, %v2494_v30  ;;  %v2502_v38 = vmax.f32 %v2105_v37, 0.0  ;;  %v3750_v37 = vld [vmem:[%s4853_s2 + $0x178] sm:$0xff]  }
 0x117   : > { %v2541_v39 = vmax.f32 %v2540_v31, %v2501_v36  ;;  %v3628_v36 = vpack.c.bf16 %v2755_v24, %v2747_v23 }
 0x118   : > { %v2561_v40 = vmax.f32 %v2560_v32, %v2502_v38 }
 0x11a   : > { %v2109_v41 = vpop.f32.mrb[20].mxu1  ;;  %3579 = vmatmul.mubr.msk.bf16.gmra.mrb[84].mxu0 %vm819_vm0, %v3746_v34 }
 0x11b   : > { %v2509_v43 = vmax.f32 %v2109_v41, 0.0  ;;  %v2111_v44 = vpop.f32.mrb[21].mxu1  ;;  %3582 = vmatprep.mubr.msk.bf16.mxu0 %vm819_vm0, %v3747_v4 }
 0x11c   : > { %v2510_v6 = vmax.f32 %v2111_v44, 0.0  ;;  %v2113_v45 = vpop.f32.mrb[22].mxu1 }
 0x11d   : > { %v2542_v46 = vmax.f32 %v2541_v39, %v2509_v43  ;;  %v2517_v47 = vmax.f32 %v2113_v45, 0.0  ;;  %v2115_v48 = vpop.f32.mrb[23].mxu1  ;;  %v3630_v39 = vpack.c.bf16 %v2758_v26, %v2750_v25 }
 0x11e   : > { %v2562_v49 = vmax.f32 %v2561_v40, %v2510_v6  ;;  %v2518_v50 = vmax.f32 %v2115_v48, 0.0 }
 0x11f   : > { %v2543_v51 = vmax.f32 %v2542_v46, %v2517_v47  ;;  %v3751_v47 = vld [vmem:[%s4853_s2 + $0x180] sm:$0xff]  }
 0x120   : > { %v2563_v52 = vmax.f32 %v2562_v49, %v2518_v50  ;;  %v3752_v50 = vld [vmem:[%s4853_s2 + $0x188] sm:$0xff]  }
 0x122   : > { %v2119_v53 = vpop.f32.mrb[24].mxu1  ;;  %3583 = vmatmul.mubr.msk.bf16.gmra.mrb[88].mxu0 %vm819_vm0, %v3748_v8 }
 0x123   : > { %v2525_v55 = vmax.f32 %v2119_v53, 0.0  ;;  %v2121_v56 = vpop.f32.mrb[25].mxu1  ;;  %3586 = vmatprep.mubr.msk.bf16.mxu0 %vm819_vm0, %v3749_v29  ;;  %v3757_v29 = vld [vmem:[%s4853_s2 + $0x1b0] sm:$0xff]  }
 0x124   : > { %v2526_v57 = vmax.f32 %v2121_v56, 0.0  ;;  %v2123_v58 = vpop.f32.mrb[26].mxu1 }
 0x125   : > { %v2545_v59 = vsel %vm2544_vm1, %v2525_v55, -inf  ;;  %v2124_v60 = vpop.f32.mrb[27].mxu1 }
 0x126   : > { %v2546_v61 = vmax.f32 %v2543_v51, %v2545_v59  ;;  %v2564_v62 = vsel %vm2544_vm1, %v2526_v57, -inf  ;;  %v3753_v60 = vld [vmem:[%s4853_s2 + $0x190] sm:$0xff]  }
 0x127   : > { %v2565_v63 = vmax.f32 %v2563_v52, %v2564_v62 }
 0x128   : > { %v2547_v0 = vrot.slane %v2546_v61, 4 }
 0x129   : > { %v2566_v1 = vrot.slane %v2565_v63, 4 }
 0x12a   : > { %v2548_v2 = vmax.f32 %v2546_v61, %v2547_v0  ;;  %v2160_v3 = vpop.f32.mrb[28].mxu1  ;;  %3587 = vmatmul.mubr.msk.bf16.gmra.mrb[92].mxu0 %vm819_vm0, %v3750_v37  ;;  %v3758_v37 = vld [vmem:[%s4853_s2 + $0x1b8] sm:$0xff]  }
 0x12b   : > { %v2567_v5 = vmax.f32 %v2565_v63, %v2566_v1  ;;  %v2162_v7 = vpop.f32.mrb[29].mxu1  ;;  %v2431_v12 = vmax.f32 %v2160_v3, 0.0  ;;  %3590 = vmatprep.mubr.msk.bf16.mxu0 %vm819_vm0, %v3751_v47  ;;  %v3754_v63 = vld [vmem:[%s4853_s2 + $0x198] sm:$0xff]  }
 0x12c   : > { %v2549_v9 = vrot.slane %v2548_v2, 2  ;;  %v2164_v10 = vpop.f32.mrb[30].mxu1  ;;  %v2432_v16 = vmax.f32 %v2162_v7, 0.0 }
 0x12d   : > { %v2568_v11 = vrot.slane %v2567_v5, 2  ;;  %v2439_v13 = vmax.f32 %v2164_v10, 0.0  ;;  %v2166_v14 = vpop.f32.mrb[31].mxu1 }
 0x12e   : > { %v2550_v15 = vmax.f32 %v2548_v2, %v2549_v9  ;;  %v2440_v17 = vmax.f32 %v2166_v14, 0.0  ;;  %v3756_v14 = vld [vmem:[%s4853_s2 + $0x1a8] sm:$0xff]  }
 0x12f   : > { %v2572_v19 = vmax.f32 %v2431_v12, %v2439_v13  ;;  %v2569_v20 = vmax.f32 %v2567_v5, %v2568_v11  ;;  %v3755_v11 = vld [vmem:[%s4853_s2 + $0x1a0] sm:$0xff]  }
 0x130   : > { %v2551_v21 = vrot.slane %v2550_v15, 1  ;;  %v2591_v22 = vmax.f32 %v2432_v16, %v2440_v17 }
 0x131   : > { %v2570_v18 = vrot.slane %v2569_v20, 1 }
 0x132   : > { %v2170_v27 = vpop.f32.mrb[32].mxu1  ;;  %v4371_v28 = vmax.f32 %v2550_v15, %v2551_v21  ;;  %3591 = vmatmul.mubr.msk.bf16.gmra.mrb[96].mxu0 %vm819_vm0, %v3752_v50  ;;  %v3759_v50 = vld [vmem:[%s4853_s2 + $0x1c0] sm:$0xff]  }
 0x133   : > { %v2447_v30 = vmax.f32 %v2170_v27, 0.0  ;;  %v2172_v35 = vpop.f32.mrb[33].mxu1  ;;  %v4376_v31 = vmax.f32 %v2569_v20, %v2570_v18  ;;  %3594 = vmatprep.mubr.msk.bf16.mxu0 %vm819_vm0, %v3753_v60  ;;  %v3496_v18 = vpop.f32.mrb[0].mxu0 }
 0x134   : > { %v2448_v32 = vmax.f32 %v2172_v35, 0.0  ;;  %v2174_v38 = vpop.f32.mrb[34].mxu1  ;;  %v1046_v25 = vpop.f32.mrb[1].mxu0 }
 0x135   : > { %v2573_v40 = vmax.f32 %v2572_v19, %v2447_v30  ;;  %v2455_v41 = vmax.f32 %v2174_v38, 0.0  ;;  %v2176_v42 = vpop.f32.mrb[35].mxu1  ;;  %v2694_v43 = vcombine.low %v4371_v28, %v4376_v31  ;;  %2826 = vmatprep.mubr.f32.mxu1 %v4376_v31  ;;  %v3497_v27 = vpop.f32.mrb[2].mxu0 }
 0x136   : > { %v2592_v44 = vmax.f32 %v2591_v22, %v2448_v32  ;;  %v2456_v33 = vmax.f32 %v2176_v42, 0.0  ;;  %2827 = vmatmul.mubr.f32.vlgmr.msra.gmra.mrb[112].mxu1 %v4371_v28 }
 0x137   : > { %v2574_v6 = vmax.f32 %v2573_v40, %v2455_v41  ;;  %3629 = vmatpush1.bf16.xpose.msra.mxu1 %v3628_v36  ;;  %v1049_v36 = vpop.f32.mrb[3].mxu0  ;;  %v1557_v40 = vmax.f32 %v1046_v25, 0.0  ;;  %v1560_v41 = vmax.f32 %v3497_v27, 0.0 }
 0x138   : > { %v2593_v45 = vmax.f32 %v2592_v44, %v2456_v33  ;;  %3631 = vmatprep.subr.bf16.mxu1 %v3630_v39  ;;  %v1559_v39 = vmax.f32 %v3496_v18, 0.0 }
 0x139   : > { %1686 = vst.msk [vmem:[%s4418_s10] sm:$0xff] %vm1685_vm2, %v1557_v40  ;;  %1689 = vst.msk [vmem:[%s4418_s10 + $0x18] sm:$0xff] %vm1685_vm2, %v1560_v41 }
 0x13a   : > { %v2180_v46 = vpop.f32.mrb[36].mxu1  ;;  %3595 = vmatmul.mubr.msk.bf16.gmra.mrb[100].mxu0 %vm819_vm0, %v3754_v63  ;;  %1688 = vst.msk [vmem:[%s4418_s10 + $0x10] sm:$0xff] %vm1685_vm2, %v1559_v39 }
 0x13b   : > { %v2463_v48 = vmax.f32 %v2180_v46, 0.0  ;;  %v2182_v49 = vpop.f32.mrb[37].mxu1  ;;  %3598 = vmatprep.mubr.msk.bf16.mxu0 %vm819_vm0, %v3755_v11 }
 0x13c   : > { %v2464_v51 = vmax.f32 %v2182_v49, 0.0  ;;  %v2184_v52 = vpop.f32.mrb[38].mxu1  ;;  %v3500_v49 = vpop.f32.mrb[4].mxu0 }
 0x13d   : > { %v2575_v53 = vmax.f32 %v2574_v6, %v2463_v48  ;;  %v2471_v54 = vmax.f32 %v2184_v52, 0.0  ;;  %v2186_v55 = vpop.f32.mrb[39].mxu1  ;;  %v1558_v6 = vmax.f32 %v1049_v36, 0.0  ;;  %v1062_v52 = vpop.f32.mrb[5].mxu0 }
 0x13e   : > { %v2594_v56 = vmax.f32 %v2593_v45, %v2464_v51  ;;  %v2472_v34 = vmax.f32 %v2186_v55, 0.0  ;;  %v1563_v51 = vmax.f32 %v3500_v49, 0.0  ;;  %v3501_v55 = vpop.f32.mrb[6].mxu0 }
 0x13f   : > { %v2576_v57 = vmax.f32 %v2575_v53, %v2471_v54  ;;  %1687 = vst.msk [vmem:[%s4418_s10 + $0x8] sm:$0xff] %vm1685_vm2, %v1558_v6  ;;  %v1561_v54 = vmax.f32 %v1062_v52, 0.0  ;;  %v2757_v6 = vld [vmem:[%s4855_s4 + $0x60] sm:$0x3f] }
 0x140   : > { %v2595_v58 = vmax.f32 %v2594_v56, %v2472_v34  ;;  %1692 = vst.msk [vmem:[%s4418_s10 + $0x30] sm:$0xff] %vm1685_vm2, %v1563_v51  ;;  %v3764_v51 = vld [vmem:[%s4853_s2 + $0x1e8] sm:$0xff]  }
 0x141   : > { %1690 = vst.msk [vmem:[%s4418_s10 + $0x20] sm:$0xff] %vm1685_vm2, %v1561_v54 }
 0x142   : > { %v2190_v59 = vpop.f32.mrb[40].mxu1  ;;  %3599 = vmatmul.mubr.msk.bf16.gmra.mrb[104].mxu0 %vm819_vm0, %v3756_v14  ;;  %v2701_v14 = vlaneseq }
 0x143   : > { %v2479_v61 = vmax.f32 %v2190_v59, 0.0  ;;  %v2192_v62 = vpop.f32.mrb[41].mxu1  ;;  %3602 = vmatprep.mubr.msk.bf16.mxu0 %vm819_vm0, %v3757_v29  ;;  %v3760_v59 = vld [vmem:[%s4853_s2 + $0x1c8] sm:$0xff]  }
 0x144   : > { %v2480_v0 = vmax.f32 %v2192_v62, 0.0  ;;  %v2194_v1 = vpop.f32.mrb[42].mxu1 }
 0x145   : > { %v2577_v2 = vmax.f32 %v2576_v57, %v2479_v61  ;;  %v2487_v3 = vmax.f32 %v2194_v1, 0.0  ;;  %v2196_v4 = vpop.f32.mrb[43].mxu1  ;;  %v1564_v57 = vmax.f32 %v3501_v55, 0.0 }
 0x146   : > { %v2596_v5 = vmax.f32 %v2595_v58, %v2480_v0  ;;  %v2488_v7 = vmax.f32 %v2196_v4, 0.0  ;;  %v1065_v58 = vpop.f32.mrb[7].mxu0  ;;  %v3761_v4 = vld [vmem:[%s4853_s2 + $0x1d0] sm:$0xff]  }
 0x147   : > { %v2578_v8 = vmax.f32 %v2577_v2, %v2487_v3  ;;  %v1562_v62 = vmax.f32 %v1065_v58, 0.0  ;;  %1693 = vst.msk [vmem:[%s4418_s10 + $0x38] sm:$0xff] %vm1685_vm2, %v1564_v57 }
 0x148   : > { %v2597_v9 = vmax.f32 %v2596_v5, %v2488_v7  ;;  %v3504_v7 = vpop.f32.mrb[8].mxu0 }
 0x149   : > { %1691 = vst.msk [vmem:[%s4418_s10 + $0x28] sm:$0xff] %vm1685_vm2, %v1562_v62  ;;  %v1567_v11 = vmax.f32 %v3504_v7, 0.0 }
 0x14a   : > { %v2200_v10 = vpop.f32.mrb[44].mxu1  ;;  %3603 = vmatmul.mubr.msk.bf16.gmra.mrb[108].mxu0 %vm819_vm0, %v3758_v37  ;;  %v2702_v37 = vshrl.u32 %v2701_v14, 7 }
 0x14b   : > { %v2495_v12 = vmax.f32 %v2200_v10, 0.0  ;;  %v2202_v13 = vpop.f32.mrb[45].mxu1  ;;  %3606 = vmatprep.mubr.msk.bf16.mxu0 %vm819_vm0, %v3759_v50  ;;  %1696 = vst.msk [vmem:[%s4418_s10 + $0x50] sm:$0xff] %vm1685_vm2, %v1567_v11 }
 0x14c   : > { %v2496_v15 = vmax.f32 %v2202_v13, 0.0  ;;  %v2204_v16 = vpop.f32.mrb[46].mxu1  ;;  %v3762_v13 = vld [vmem:[%s4853_s2 + $0x1d8] sm:$0xff]  }
 0x14d   : > { %v2579_v17 = vmax.f32 %v2578_v8, %v2495_v12  ;;  %v2503_v19 = vmax.f32 %v2204_v16, 0.0  ;;  %v2206_v20 = vpop.f32.mrb[47].mxu1  ;;  %v3868_v8 = vmov 1966171168   ;;  %v1078_v12 = vpop.f32.mrb[9].mxu0 }
 0x14e   : > { %v2598_v21 = vmax.f32 %v2597_v9, %v2496_v15  ;;  %v2504_v22 = vmax.f32 %v2206_v20, 0.0  ;;  %v2699_v9 = vunpack.c.l.s4 %v3868_v8  ;;  %v3763_v20 = vld [vmem:[%s4853_s2 + $0x1e0] sm:$0xff]  }
 0x14f   : > { %v2580_v23 = vmax.f32 %v2579_v17, %v2503_v19  ;;  %v1565_v17 = vmax.f32 %v1078_v12, 0.0  ;;  %v3505_v19 = vpop.f32.mrb[10].mxu0 }
 0x150   : > { %v2599_v24 = vmax.f32 %v2598_v21, %v2504_v22  ;;  %v2700_v27 = vunpack.c.0.s8 %v2699_v9 }
 0x151   : > { %1694 = vst.msk [vmem:[%s4418_s10 + $0x40] sm:$0xff] %vm1685_vm2, %v1565_v17  ;;  %v3766_v17 = vld [vmem:[%s4853_s2 + $0x1f8] sm:$0xff]  }
 0x152   : > { %v2210_v26 = vpop.f32.mrb[48].mxu1  ;;  %3607 = vmatmul.mubr.msk.bf16.gmra.mrb[112].mxu0 %vm819_vm0, %v3760_v59  ;;  %v4486_v52 = vsub.s32 %v2700_v27, %v2702_v37 }
 0x153   : > { %v2511_v30 = vmax.f32 %v2210_v26, 0.0  ;;  %v2212_v35 = vpop.f32.mrb[49].mxu1  ;;  %3610 = vmatprep.mubr.msk.bf16.mxu0 %vm819_vm0, %v3761_v4 }
 0x154   : > { %v2512_v32 = vmax.f32 %v2212_v35, 0.0  ;;  %v2214_v38 = vpop.f32.mrb[50].mxu1 }
 0x155   : > { %v2581_v42 = vmax.f32 %v2580_v23, %v2511_v30  ;;  %v2519_v44 = vmax.f32 %v2214_v38, 0.0  ;;  %v2216_v33 = vpop.f32.mrb[51].mxu1  ;;  %v1568_v23 = vmax.f32 %v3505_v19, 0.0 }
 0x156   : > { %v2600_v45 = vmax.f32 %v2599_v24, %v2512_v32  ;;  %v2520_v46 = vmax.f32 %v2216_v33, 0.0  ;;  %v1081_v24 = vpop.f32.mrb[11].mxu0  ;;  %v2749_v33 = vld [vmem:[%s4855_s4 + $0x20] sm:$0xff] }
 0x157   : > { %v2582_v47 = vmax.f32 %v2581_v42, %v2519_v44  ;;  %v1566_v26 = vmax.f32 %v1081_v24, 0.0  ;;  %1697 = vst.msk [vmem:[%s4418_s10 + $0x58] sm:$0xff] %vm1685_vm2, %v1568_v23 }
 0x158   : > { %v2601_v48 = vmax.f32 %v2600_v45, %v2520_v46  ;;  %v2752_v45 = vld [vmem:[%s4855_s4 + $0x38] sm:$0xff]  ;;  %v3508_v46 = vpop.f32.mrb[12].mxu0 }
 0x159   : > { %1695 = vst.msk [vmem:[%s4418_s10 + $0x48] sm:$0xff] %vm1685_vm2, %v1566_v26  ;;  %v1571_v49 = vmax.f32 %v3508_v46, 0.0  ;;  %v1094_v50 = vpop.f32.mrb[13].mxu0 }
 0x15a   : > { %v2220_v53 = vpop.f32.mrb[52].mxu1  ;;  %3611 = vmatmul.mubr.msk.bf16.gmra.mrb[116].mxu0 %vm819_vm0, %v3762_v13  ;;  %v1569_v55 = vmax.f32 %v1094_v50, 0.0 }
 0x15b   : > { %v2527_v56 = vmax.f32 %v2220_v53, 0.0  ;;  %v2222_v34 = vpop.f32.mrb[53].mxu1  ;;  %3614 = vmatprep.mubr.msk.bf16.mxu0 %vm819_vm0, %v3763_v20  ;;  %1700 = vst.msk [vmem:[%s4418_s10 + $0x70] sm:$0xff] %vm1685_vm2, %v1571_v49 }
 0x15c   : > { %v2528_v60 = vmax.f32 %v2222_v34, 0.0  ;;  %v2224_v61 = vpop.f32.mrb[54].mxu1  ;;  %v3765_v34 = vld [vmem:[%s4853_s2 + $0x1f0] sm:$0xff]   ;;  %1698 = vst.msk [vmem:[%s4418_s10 + $0x60] sm:$0xff] %vm1685_vm2, %v1569_v55 }
 0x15d   : > { %v2583_v63 = vsel %vm2544_vm1, %v2527_v56, -inf  ;;  %v2225_v0 = vpop.f32.mrb[55].mxu1  ;;  %v3509_v56 = vpop.f32.mrb[14].mxu0 }
 0x15e   : > { %v2584_v1 = vmax.f32 %v2582_v47, %v2583_v63  ;;  %v2602_v2 = vsel %vm2544_vm1, %v2528_v60, -inf  ;;  %v3632_v60 = vpack.c.bf16 %v2757_v6, %v2749_v33  ;;  %v1572_v61 = vmax.f32 %v3509_v56, 0.0  ;;  %v1097_v62 = vpop.f32.mrb[15].mxu0 }
 0x15f   : > { %v2603_v3 = vmax.f32 %v2601_v48, %v2602_v2  ;;  %v2760_v48 = vld [vmem:[%s4855_s4 + $0x78] sm:$0x3f]  ;;  %v1570_v2 = vmax.f32 %v1097_v62, 0.0  ;;  %v3512_v14 = vpop.f32.mrb[16].mxu0 }
 0x160   : > { %v2585_v5 = vrot.slane %v2584_v1, 4  ;;  %1701 = vst.msk [vmem:[%s4418_s10 + $0x78] sm:$0xff] %vm1685_vm2, %v1572_v61 }
 0x161   : > { %v2604_v10 = vrot.slane %v2603_v3, 4  ;;  %1699 = vst.msk [vmem:[%s4418_s10 + $0x68] sm:$0xff] %vm1685_vm2, %v1570_v2 }
 0x162   : > { %v2586_v15 = vmax.f32 %v2584_v1, %v2585_v5  ;;  %v2261_v16 = vpop.f32.mrb[56].mxu1  ;;  %v3634_v1 = vpack.c.bf16 %v2760_v48, %v2752_v45  ;;  %3615 = vmatmul.mubr.msk.bf16.gmra.mrb[120].mxu0 %vm819_vm0, %v3764_v51 }
 0x163   : > { %v2605_v21 = vmax.f32 %v2603_v3, %v2604_v10  ;;  %v2263_v22 = vpop.f32.mrb[57].mxu1  ;;  %v2433_v30 = vmax.f32 %v2261_v16, 0.0  ;;  %3618 = vmatprep.mubr.msk.bf16.mxu0 %vm819_vm0, %v3765_v34  ;;  %v4505_v10 = vrot.slane %v2694_v43, %v4486_v52  ;;  %v1110_v16 = vpop.f32.mrb[17].mxu0 }
 0x164   : > { %v2587_v18 = vrot.slane %v2586_v15, 2  ;;  %v2265_v25 = vpop.f32.mrb[58].mxu1  ;;  %v2434_v38 = vmax.f32 %v2263_v22, 0.0  ;;  %v1573_v43 = vmax.f32 %v1110_v16, 0.0  ;;  %v3513_v19 = vpop.f32.mrb[18].mxu0 }
 0x165   : > { %v2606_v29 = vrot.slane %v2605_v21, 2  ;;  %v2441_v35 = vmax.f32 %v2265_v25, 0.0  ;;  %v2267_v36 = vpop.f32.mrb[59].mxu1  ;;  %v1576_v22 = vmax.f32 %v3513_v19, 0.0  ;;  %v1113_v23 = vpop.f32.mrb[19].mxu0 }
 0x166   : > { %v2588_v32 = vmax.f32 %v2586_v15, %v2587_v18  ;;  %v2442_v39 = vmax.f32 %v2267_v36, 0.0  ;;  %v1575_v15 = vmax.f32 %v3512_v14, 0.0  ;;  %1702 = vst.msk [vmem:[%s4418_s10 + $0x80] sm:$0xff] %vm1685_vm2, %v1573_v43  ;;  %v1574_v25 = vmax.f32 %v1113_v23, 0.0 }
 0x167   : > { %v2610_v40 = vmax.f32 %v2433_v30, %v2441_v35  ;;  %v2607_v41 = vmax.f32 %v2605_v21, %v2606_v29  ;;  %1705 = vst.msk [vmem:[%s4418_s10 + $0x98] sm:$0xff] %vm1685_vm2, %v1576_v22 }
 0x168   : > { %v2589_v42 = vrot.slane %v2588_v32, 1  ;;  %v2629_v44 = vmax.f32 %v2434_v38, %v2442_v39  ;;  %1704 = vst.msk [vmem:[%s4418_s10 + $0x90] sm:$0xff] %vm1685_vm2, %v1575_v15  ;;  %1703 = vst.msk [vmem:[%s4418_s10 + $0x88] sm:$0xff] %vm1685_vm2, %v1574_v25 }
 0x169   : > { %v2608_v47 = vrot.slane %v2607_v41, 1 }
 0x16a   : > { %v2271_v53 = vpop.f32.mrb[60].mxu1  ;;  %v2590_v54 = vmax.f32 %v2588_v32, %v2589_v42  ;;  %3619 = vmatmul.mubr.msk.bf16.gmra.mrb[124].mxu0 %vm819_vm0, %v3766_v17  ;;  %v3516_v32 = vpop.f32.mrb[20].mxu0 }
 0x16b   : > { %v2449_v57 = vmax.f32 %v2271_v53, 0.0  ;;  %v2273_v58 = vpop.f32.mrb[61].mxu1  ;;  %v2609_v59 = vmax.f32 %v2607_v41, %v2608_v47  ;;  %v1579_v38 = vmax.f32 %v3516_v32, 0.0  ;;  %v1126_v39 = vpop.f32.mrb[21].mxu0 }
 0x16c   : > { %v2450_v63 = vmax.f32 %v2273_v58, 0.0  ;;  %v2275_v0 = vpop.f32.mrb[62].mxu1  ;;  %v1577_v41 = vmax.f32 %v1126_v39, 0.0  ;;  %v3517_v42 = vpop.f32.mrb[22].mxu0 }
 0x16d   : > { %v2611_v3 = vmax.f32 %v2610_v40, %v2449_v57  ;;  %v2457_v4 = vmax.f32 %v2275_v0, 0.0  ;;  %v2277_v5 = vpop.f32.mrb[63].mxu1  ;;  %v2695_v7 = vcombine.low %v2590_v54, %v2609_v59  ;;  %2896 = vmatprep.mubr.f32.mxu1 %v2609_v59  ;;  %1708 = vst.msk [vmem:[%s4418_s10 + $0xb0] sm:$0xff] %vm1685_vm2, %v1579_v38  ;;  %v1580_v6 = vmax.f32 %v3517_v42, 0.0  ;;  %v1129_v45 = vpop.f32.mrb[23].mxu0 }
 0x16e   : > { %v2630_v8 = vmax.f32 %v2629_v44, %v2450_v63  ;;  %v2458_v9 = vmax.f32 %v2277_v5, 0.0  ;;  %2897 = vmatmul.mubr.f32.vlgmr.msra.gmra.mrb[112].mxu1 %v2590_v54  ;;  %1706 = vst.msk [vmem:[%s4418_s10 + $0xa0] sm:$0xff] %vm1685_vm2, %v1577_v41  ;;  %v1578_v48 = vmax.f32 %v1129_v45, 0.0  ;;  %v3520_v34 = vpop.f32.mrb[24].mxu0 }
 0x16f   : > { %v2612_v11 = vmax.f32 %v2611_v3, %v2457_v4  ;;  %v4508_v12 = vrot.slane %v2695_v7, %v4486_v52  ;;  %3633 = vmatpush1.bf16.xpose.msra.mxu1 %v3632_v60  ;;  %1709 = vst.msk [vmem:[%s4418_s10 + $0xb8] sm:$0xff] %vm1685_vm2, %v1580_v6  ;;  %v1583_v57 = vmax.f32 %v3520_v34, 0.0  ;;  %v1142_v58 = vpop.f32.mrb[25].mxu0 }
 0x170   : > { %v2631_v13 = vmax.f32 %v2630_v8, %v2458_v9  ;;  %3635 = vmatprep.subr.bf16.mxu1 %v3634_v1  ;;  %1707 = vst.msk [vmem:[%s4418_s10 + $0xa8] sm:$0xff] %vm1685_vm2, %v1578_v48  ;;  %v1581_v60 = vmax.f32 %v1142_v58, 0.0  ;;  %v3521_v61 = vpop.f32.mrb[26].mxu0 }
 0x171   : > { %v2726_v28 = vcombine.low %v4505_v10, %v4508_v12  ;;  %1712 = vst.msk [vmem:[%s4418_s10 + $0xd0] sm:$0xff] %vm1685_vm2, %v1583_v57  ;;  %v1584_v0 = vmax.f32 %v3521_v61, 0.0  ;;  %v1145_v1 = vpop.f32.mrb[27].mxu0 }
 0x172   : > { %v2281_v31 = vpop.f32.mrb[64].mxu1  ;;  %1710 = vst.msk [vmem:[%s4418_s10 + $0xc0] sm:$0xff] %vm1685_vm2, %v1581_v60  ;;  %v1582_v4 = vmax.f32 %v1145_v1, 0.0  ;;  %v3524_v15 = vpop.f32.mrb[28].mxu0 }
 0x173   : > { %v2465_v20 = vmax.f32 %v2281_v31, 0.0  ;;  %v2283_v21 = vpop.f32.mrb[65].mxu1  ;;  %1713 = vst.msk [vmem:[%s4418_s10 + $0xd8] sm:$0xff] %vm1685_vm2, %v1584_v0  ;;  %v1587_v16 = vmax.f32 %v3524_v15, 0.0  ;;  %v1158_v17 = vpop.f32.mrb[29].mxu0 }
 0x174   : > { %v2466_v24 = vmax.f32 %v2283_v21, 0.0  ;;  %v2285_v18 = vpop.f32.mrb[66].mxu1  ;;  %1711 = vst.msk [vmem:[%s4418_s10 + $0xc8] sm:$0xff] %vm1685_vm2, %v1582_v4  ;;  %v1585_v43 = vmax.f32 %v1158_v17, 0.0  ;;  %v3525_v19 = vpop.f32.mrb[30].mxu0 }
 0x175   : > { %v2613_v26 = vmax.f32 %v2612_v11, %v2465_v20  ;;  %v2473_v27 = vmax.f32 %v2285_v18, 0.0  ;;  %v2287_v29 = vpop.f32.mrb[67].mxu1  ;;  %1716 = vst.msk [vmem:[%s4418_s10 + $0xf0] sm:$0xff] %vm1685_vm2, %v1587_v16  ;;  %v1588_v22 = vmax.f32 %v3525_v19, 0.0  ;;  %v1161_v23 = vpop.f32.mrb[31].mxu0  ;;  %v2751_v19 = vld [vmem:[%s4855_s4 + $0x30] sm:$0xff] }
 0x176   : > { %v2632_v30 = vmax.f32 %v2631_v13, %v2466_v24  ;;  %v2474_v35 = vmax.f32 %v2287_v29, 0.0  ;;  %1714 = vst.msk [vmem:[%s4418_s10 + $0xe0] sm:$0xff] %vm1685_vm2, %v1585_v43  ;;  %v1586_v25 = vmax.f32 %v1161_v23, 0.0  ;;  %v3528_v32 = vpop.f32.mrb[32].mxu0 }
 0x177   : > { %v2614_v36 = vmax.f32 %v2613_v26, %v2473_v27  ;;  %1717 = vst.msk [vmem:[%s4418_s10 + $0xf8] sm:$0xff] %vm1685_vm2, %v1588_v22  ;;  %v1591_v38 = vmax.f32 %v3528_v32, 0.0  ;;  %v1174_v39 = vpop.f32.mrb[33].mxu0 }
 0x178   : > { %v2633_v37 = vmax.f32 %v2632_v30, %v2474_v35  ;;  %1715 = vst.msk [vmem:[%s4418_s10 + $0xe8] sm:$0xff] %vm1685_vm2, %v1586_v25  ;;  %v1589_v41 = vmax.f32 %v1174_v39, 0.0  ;;  %v3529_v42 = vpop.f32.mrb[34].mxu0 }
 0x179   : > { %1720 = vst.msk [vmem:[%s4418_s10 + $0x110] sm:$0xff] %vm1685_vm2, %v1591_v38  ;;  %v1592_v6 = vmax.f32 %v3529_v42, 0.0  ;;  %v1177_v45 = vpop.f32.mrb[35].mxu0 }
 0x17a   : > { %v2291_v40 = vpop.f32.mrb[68].mxu1  ;;  %1718 = vst.msk [vmem:[%s4418_s10 + $0x100] sm:$0xff] %vm1685_vm2, %v1589_v41  ;;  %v1590_v48 = vmax.f32 %v1177_v45, 0.0 }
 0x17b   : > { %v2481_v44 = vmax.f32 %v2291_v40, 0.0  ;;  %v2293_v33 = vpop.f32.mrb[69].mxu1  ;;  %1721 = vst.msk [vmem:[%s4418_s10 + $0x118] sm:$0xff] %vm1685_vm2, %v1592_v6 }
 0x17c   : > { %v2482_v46 = vmax.f32 %v2293_v33, 0.0  ;;  %v2295_v47 = vpop.f32.mrb[70].mxu1  ;;  %1719 = vst.msk [vmem:[%s4418_s10 + $0x108] sm:$0xff] %vm1685_vm2, %v1590_v48 }
 0x17d   : > { %v2615_v49 = vmax.f32 %v2614_v36, %v2481_v44  ;;  %v2489_v50 = vmax.f32 %v2295_v47, 0.0  ;;  %v2297_v51 = vpop.f32.mrb[71].mxu1 }
 0x17e   : > { %v2634_v53 = vmax.f32 %v2633_v37, %v2482_v46  ;;  %v2490_v54 = vmax.f32 %v2297_v51, 0.0 }
 0x17f   : > { %v2616_v55 = vmax.f32 %v2615_v49, %v2489_v50 }
 0x180   : > { %v2635_v56 = vmax.f32 %v2634_v53, %v2490_v54 }
 0x182   : > { %v2301_v59 = vpop.f32.mrb[72].mxu1 }
 0x183   : > { %v2497_v62 = vmax.f32 %v2301_v59, 0.0  ;;  %v2303_v63 = vpop.f32.mrb[73].mxu1 }
 0x184   : > { %v2498_v2 = vmax.f32 %v2303_v63, 0.0  ;;  %v2305_v3 = vpop.f32.mrb[74].mxu1 }
 0x185   : > { %v2617_v5 = vmax.f32 %v2616_v55, %v2497_v62  ;;  %v2505_v7 = vmax.f32 %v2305_v3, 0.0  ;;  %v2307_v8 = vpop.f32.mrb[75].mxu1 }
 0x186   : > { %v2636_v9 = vmax.f32 %v2635_v56, %v2498_v2  ;;  %v2506_v11 = vmax.f32 %v2307_v8, 0.0  ;;  %v3532_v56 = vpop.f32.mrb[36].mxu0 }
 0x187   : > { %v2618_v13 = vmax.f32 %v2617_v5, %v2505_v7  ;;  %v1595_v57 = vmax.f32 %v3532_v56, 0.0  ;;  %v1190_v58 = vpop.f32.mrb[37].mxu0 }
 0x188   : > { %v2637_v14 = vmax.f32 %v2636_v9, %v2506_v11  ;;  %v1593_v61 = vmax.f32 %v1190_v58, 0.0  ;;  %v3533_v62 = vpop.f32.mrb[38].mxu0 }
 0x189   : > { %1724 = vst.msk [vmem:[%s4418_s10 + $0x130] sm:$0xff] %vm1685_vm2, %v1595_v57  ;;  %v1596_v1 = vmax.f32 %v3533_v62, 0.0  ;;  %v1193_v2 = vpop.f32.mrb[39].mxu0 }
 0x18a   : > { %v2311_v31 = vpop.f32.mrb[76].mxu1  ;;  %1722 = vst.msk [vmem:[%s4418_s10 + $0x120] sm:$0xff] %vm1685_vm2, %v1593_v61  ;;  %v1594_v5 = vmax.f32 %v1193_v2, 0.0 }
 0x18b   : > { %v2513_v20 = vmax.f32 %v2311_v31, 0.0  ;;  %v2313_v21 = vpop.f32.mrb[77].mxu1  ;;  %1725 = vst.msk [vmem:[%s4418_s10 + $0x138] sm:$0xff] %vm1685_vm2, %v1596_v1 }
 0x18c   : > { %v2514_v24 = vmax.f32 %v2313_v21, 0.0  ;;  %v2315_v18 = vpop.f32.mrb[78].mxu1  ;;  %1723 = vst.msk [vmem:[%s4418_s10 + $0x128] sm:$0xff] %vm1685_vm2, %v1594_v5  ;;  %v3536_v21 = vpop.f32.mrb[40].mxu0 }
 0x18d   : > { %v2619_v26 = vmax.f32 %v2618_v13, %v2513_v20  ;;  %v2521_v27 = vmax.f32 %v2315_v18, 0.0  ;;  %v2317_v29 = vpop.f32.mrb[79].mxu1  ;;  %v2759_v20 = vld [vmem:[%s4855_s4 + $0x70] sm:$0x3f]  ;;  %v1599_v23 = vmax.f32 %v3536_v21, 0.0 }
 0x18e   : > { %v2638_v30 = vmax.f32 %v2637_v14, %v2514_v24  ;;  %v2522_v35 = vmax.f32 %v2317_v29, 0.0  ;;  %v1206_v24 = vpop.f32.mrb[41].mxu0 }
 0x18f   : > { %v2620_v36 = vmax.f32 %v2619_v26, %v2521_v27  ;;  %v1597_v26 = vmax.f32 %v1206_v24, 0.0  ;;  %v3537_v27 = vpop.f32.mrb[42].mxu0  ;;  %1728 = vst.msk [vmem:[%s4418_s10 + $0x150] sm:$0xff] %vm1685_vm2, %v1599_v23 }
 0x190   : > { %v2639_v37 = vmax.f32 %v2638_v30, %v2522_v35  ;;  %v1209_v32 = vpop.f32.mrb[43].mxu0 }
 0x191   : > { %1726 = vst.msk [vmem:[%s4418_s10 + $0x140] sm:$0xff] %vm1685_vm2, %v1597_v26 }
 0x192   : > { %v2321_v40 = vpop.f32.mrb[80].mxu1 }
 0x193   : > { %v2529_v44 = vmax.f32 %v2321_v40, 0.0  ;;  %v2323_v33 = vpop.f32.mrb[81].mxu1  ;;  %v1598_v40 = vmax.f32 %v1209_v32, 0.0 }
 0x194   : > { %v2530_v46 = vmax.f32 %v2323_v33, 0.0  ;;  %v2325_v47 = vpop.f32.mrb[82].mxu1 }
 0x195   : > { %v2621_v49 = vsel %vm2544_vm1, %v2529_v44, -inf  ;;  %v2326_v50 = vpop.f32.mrb[83].mxu1  ;;  %1727 = vst.msk [vmem:[%s4418_s10 + $0x148] sm:$0xff] %vm1685_vm2, %v1598_v40 }
 0x196   : > { %v2622_v51 = vmax.f32 %v2620_v36, %v2621_v49  ;;  %v2640_v53 = vsel %vm2544_vm1, %v2530_v46, -inf  ;;  %v3636_v36 = vpack.c.bf16 %v2759_v20, %v2751_v19 }
 0x197   : > { %v2641_v54 = vmax.f32 %v2639_v37, %v2640_v53  ;;  %v1600_v37 = vmax.f32 %v3537_v27, 0.0 }
 0x198   : > { %v2623_v55 = vrot.slane %v2622_v51, 4 }
 0x199   : > { %v2642_v34 = vrot.slane %v2641_v54, 4  ;;  %1729 = vst.msk [vmem:[%s4418_s10 + $0x158] sm:$0xff] %vm1685_vm2, %v1600_v37 }
 0x19a   : > { %v2624_v59 = vmax.f32 %v2622_v51, %v2623_v55  ;;  %v2362_v60 = vpop.f32.mrb[84].mxu1 }
 0x19b   : > { %v2643_v63 = vmax.f32 %v2641_v54, %v2642_v34  ;;  %v2364_v0 = vpop.f32.mrb[85].mxu1  ;;  %v2435_v8 = vmax.f32 %v2362_v60, 0.0 }
 0x19c   : > { %v2625_v3 = vrot.slane %v2624_v59, 2  ;;  %v2366_v4 = vpop.f32.mrb[86].mxu1  ;;  %v2436_v14 = vmax.f32 %v2364_v0, 0.0 }
 0x19d   : > { %v2644_v7 = vrot.slane %v2643_v63, 2  ;;  %v2443_v9 = vmax.f32 %v2366_v4, 0.0  ;;  %v2368_v11 = vpop.f32.mrb[87].mxu1  ;;  %v3540_v48 = vpop.f32.mrb[44].mxu0 }
 0x19e   : > { %v2626_v13 = vmax.f32 %v2624_v59, %v2625_v3  ;;  %v2444_v15 = vmax.f32 %v2368_v11, 0.0  ;;  %v1603_v49 = vmax.f32 %v3540_v48, 0.0  ;;  %v1222_v50 = vpop.f32.mrb[45].mxu0 }
 0x19f   : > { %v2648_v16 = vmax.f32 %v2435_v8, %v2443_v9  ;;  %v2645_v17 = vmax.f32 %v2643_v63, %v2644_v7  ;;  %v1601_v53 = vmax.f32 %v1222_v50, 0.0  ;;  %v3541_v54 = vpop.f32.mrb[46].mxu0 }
 0x1a0   : > { %v2627_v31 = vrot.slane %v2626_v13, 1  ;;  %v2667_v43 = vmax.f32 %v2436_v14, %v2444_v15  ;;  %1732 = vst.msk [vmem:[%s4418_s10 + $0x170] sm:$0xff] %vm1685_vm2, %v1603_v49  ;;  %v1604_v34 = vmax.f32 %v3541_v54, 0.0  ;;  %v1225_v57 = vpop.f32.mrb[47].mxu0 }
 0x1a1   : > { %v2646_v22 = vrot.slane %v2645_v17, 1  ;;  %1730 = vst.msk [vmem:[%s4418_s10 + $0x160] sm:$0xff] %vm1685_vm2, %v1601_v53  ;;  %v1602_v60 = vmax.f32 %v1225_v57, 0.0 }
 0x1a2   : > { %v2372_v18 = vpop.f32.mrb[88].mxu1  ;;  %v4572_v25 = vmax.f32 %v2626_v13, %v2627_v31  ;;  %1733 = vst.msk [vmem:[%s4418_s10 + $0x178] sm:$0xff] %vm1685_vm2, %v1604_v34 }
 0x1a3   : > { %v2451_v29 = vmax.f32 %v2372_v18, 0.0  ;;  %v2374_v30 = vpop.f32.mrb[89].mxu1  ;;  %v4574_v35 = vmax.f32 %v2645_v17, %v2646_v22  ;;  %1731 = vst.msk [vmem:[%s4418_s10 + $0x168] sm:$0xff] %vm1685_vm2, %v1602_v60 }
 0x1a4   : > { %v2452_v38 = vmax.f32 %v2374_v30, 0.0  ;;  %v2376_v39 = vpop.f32.mrb[90].mxu1 }
 0x1a5   : > { %v2649_v41 = vmax.f32 %v2648_v16, %v2451_v29  ;;  %v2459_v42 = vmax.f32 %v2376_v39, 0.0  ;;  %v2378_v44 = vpop.f32.mrb[91].mxu1  ;;  %v2696_v33 = vcombine.low %v4572_v25, %v4574_v35  ;;  %2966 = vmatprep.mubr.f32.mxu1 %v4574_v35  ;;  %v3544_v4 = vpop.f32.mrb[48].mxu0 }
 0x1a6   : > { %v2668_v6 = vmax.f32 %v2667_v43, %v2452_v38  ;;  %v2460_v45 = vmax.f32 %v2378_v44, 0.0  ;;  %2967 = vmatmul.mubr.f32.vlgmr.msra.gmra.mrb[112].mxu1 %v4572_v25  ;;  %v1607_v5 = vmax.f32 %v3544_v4, 0.0  ;;  %v1238_v7 = vpop.f32.mrb[49].mxu0  ;;  %v2734_v25 = vrot.slane %v2726_v28, %v4486_v52 }
 0x1a7   : > { %v2650_v46 = vmax.f32 %v2649_v41, %v2459_v42  ;;  %3637 = vmatpush1.bf16.xpose.msra.mxu1 %v3636_v36  ;;  %v1605_v9 = vmax.f32 %v1238_v7, 0.0  ;;  %v3545_v11 = vpop.f32.mrb[50].mxu0 }
 0x1a8   : > { %v2669_v47 = vmax.f32 %v2668_v6, %v2460_v45  ;;  %1736 = vst.msk [vmem:[%s4418_s10 + $0x190] sm:$0xff] %vm1685_vm2, %v1607_v5  ;;  %v1608_v15 = vmax.f32 %v3545_v11, 0.0  ;;  %v1241_v16 = vpop.f32.mrb[51].mxu0 }
 0x1a9   : > { %1734 = vst.msk [vmem:[%s4418_s10 + $0x180] sm:$0xff] %vm1685_vm2, %v1605_v9  ;;  %v1606_v43 = vmax.f32 %v1241_v16, 0.0 }
 0x1aa   : > { %v2382_v51 = vpop.f32.mrb[92].mxu1  ;;  %1737 = vst.msk [vmem:[%s4418_s10 + $0x198] sm:$0xff] %vm1685_vm2, %v1608_v15 }
 0x1ab   : > { %v2467_v55 = vmax.f32 %v2382_v51, 0.0  ;;  %v2384_v56 = vpop.f32.mrb[93].mxu1  ;;  %1735 = vst.msk [vmem:[%s4418_s10 + $0x188] sm:$0xff] %vm1685_vm2, %v1606_v43 }
 0x1ac   : > { %v2468_v58 = vmax.f32 %v2384_v56, 0.0  ;;  %v2386_v59 = vpop.f32.mrb[94].mxu1 }
 0x1ad   : > { %v2651_v61 = vmax.f32 %v2650_v46, %v2467_v55  ;;  %v2475_v62 = vmax.f32 %v2386_v59, 0.0  ;;  %v2388_v63 = vpop.f32.mrb[95].mxu1  ;;  %v3548_v26 = vpop.f32.mrb[52].mxu0 }
 0x1ae   : > { %v2670_v0 = vmax.f32 %v2669_v47, %v2468_v58  ;;  %v2476_v1 = vmax.f32 %v2388_v63, 0.0  ;;  %v1611_v27 = vmax.f32 %v3548_v26, 0.0  ;;  %v1254_v29 = vpop.f32.mrb[53].mxu0 }
 0x1af   : > { %v2652_v2 = vmax.f32 %v2651_v61, %v2475_v62  ;;  %v1609_v36 = vmax.f32 %v1254_v29, 0.0  ;;  %v3549_v37 = vpop.f32.mrb[54].mxu0 }
 0x1b0   : > { %v2671_v3 = vmax.f32 %v2670_v0, %v2476_v1  ;;  %1740 = vst.msk [vmem:[%s4418_s10 + $0x1b0] sm:$0xff] %vm1685_vm2, %v1611_v27  ;;  %v1612_v39 = vmax.f32 %v3549_v37, 0.0  ;;  %v1257_v40 = vpop.f32.mrb[55].mxu0 }
 0x1b1   : > { %1738 = vst.msk [vmem:[%s4418_s10 + $0x1a0] sm:$0xff] %vm1685_vm2, %v1609_v36  ;;  %v1610_v44 = vmax.f32 %v1257_v40, 0.0 }
 0x1b2   : > { %v2392_v8 = vpop.f32.mrb[96].mxu1  ;;  %1741 = vst.msk [vmem:[%s4418_s10 + $0x1b8] sm:$0xff] %vm1685_vm2, %v1612_v39 }
 0x1b3   : > { %v2483_v13 = vmax.f32 %v2392_v8, 0.0  ;;  %v2394_v14 = vpop.f32.mrb[97].mxu1  ;;  %1739 = vst.msk [vmem:[%s4418_s10 + $0x1a8] sm:$0xff] %vm1685_vm2, %v1610_v44 }
 0x1b4   : > { %v2484_v17 = vmax.f32 %v2394_v14, 0.0  ;;  %v2396_v31 = vpop.f32.mrb[98].mxu1 }
 0x1b5   : > { %v2653_v19 = vmax.f32 %v2652_v2, %v2483_v13  ;;  %v2491_v20 = vmax.f32 %v2396_v31, 0.0  ;;  %v2398_v21 = vpop.f32.mrb[99].mxu1  ;;  %v3552_v51 = vpop.f32.mrb[56].mxu0 }
 0x1b6   : > { %v2672_v22 = vmax.f32 %v2671_v3, %v2484_v17  ;;  %v2492_v23 = vmax.f32 %v2398_v21, 0.0  ;;  %v1615_v53 = vmax.f32 %v3552_v51, 0.0  ;;  %v1270_v54 = vpop.f32.mrb[57].mxu0 }
 0x1b7   : > { %v2654_v24 = vmax.f32 %v2653_v19, %v2491_v20  ;;  %v1613_v56 = vmax.f32 %v1270_v54, 0.0  ;;  %v3553_v34 = vpop.f32.mrb[58].mxu0 }
 0x1b8   : > { %v2673_v18 = vmax.f32 %v2672_v22, %v2492_v23  ;;  %1744 = vst.msk [vmem:[%s4418_s10 + $0x1d0] sm:$0xff] %vm1685_vm2, %v1615_v53  ;;  %v1616_v59 = vmax.f32 %v3553_v34, 0.0  ;;  %v1273_v60 = vpop.f32.mrb[59].mxu0 }
 0x1b9   : > { %1742 = vst.msk [vmem:[%s4418_s10 + $0x1c0] sm:$0xff] %vm1685_vm2, %v1613_v56  ;;  %v1614_v63 = vmax.f32 %v1273_v60, 0.0 }
 0x1ba   : > { %v2402_v30 = vpop.f32.mrb[100].mxu1  ;;  %1745 = vst.msk [vmem:[%s4418_s10 + $0x1d8] sm:$0xff] %vm1685_vm2, %v1616_v59 }
 0x1bb   : > { %v2499_v32 = vmax.f32 %v2402_v30, 0.0  ;;  %v2404_v38 = vpop.f32.mrb[101].mxu1  ;;  %1743 = vst.msk [vmem:[%s4418_s10 + $0x1c8] sm:$0xff] %vm1685_vm2, %v1614_v63 }
 0x1bc   : > { %v2500_v41 = vmax.f32 %v2404_v38, 0.0  ;;  %v2406_v42 = vpop.f32.mrb[102].mxu1 }
 0x1bd   : > { %v2655_v6 = vmax.f32 %v2654_v24, %v2499_v32  ;;  %v2507_v45 = vmax.f32 %v2406_v42, 0.0  ;;  %v2408_v46 = vpop.f32.mrb[103].mxu1  ;;  %v3556_v8 = vpop.f32.mrb[60].mxu0 }
 0x1be   : > { %v2674_v47 = vmax.f32 %v2673_v18, %v2500_v41  ;;  %v2508_v48 = vmax.f32 %v2408_v46, 0.0  ;;  %v1619_v9 = vmax.f32 %v3556_v8, 0.0  ;;  %v1286_v11 = vpop.f32.mrb[61].mxu0 }
 0x1bf   : > { %v2656_v49 = vmax.f32 %v2655_v6, %v2507_v45  ;;  %v1617_v14 = vmax.f32 %v1286_v11, 0.0  ;;  %v3557_v15 = vpop.f32.mrb[62].mxu0 }
 0x1c0   : > { %v2675_v50 = vmax.f32 %v2674_v47, %v2508_v48  ;;  %1748 = vst.msk [vmem:[%s4418_s10 + $0x1f0] sm:$0xff] %vm1685_vm2, %v1619_v9  ;;  %v1620_v31 = vmax.f32 %v3557_v15, 0.0  ;;  %v1289_v43 = vpop.f32.mrb[63].mxu0 }
 0x1c1   : > { %1746 = vst.msk [vmem:[%s4418_s10 + $0x1e0] sm:$0xff] %vm1685_vm2, %v1617_v14  ;;  %v1618_v21 = vmax.f32 %v1289_v43, 0.0 }
 0x1c2   : > { %v2412_v55 = vpop.f32.mrb[104].mxu1  ;;  %1749 = vst.msk [vmem:[%s4418_s10 + $0x1f8] sm:$0xff] %vm1685_vm2, %v1620_v31 }
 0x1c3   : > { %v2515_v57 = vmax.f32 %v2412_v55, 0.0  ;;  %v2414_v58 = vpop.f32.mrb[105].mxu1  ;;  %1747 = vst.msk [vmem:[%s4418_s10 + $0x1e8] sm:$0xff] %vm1685_vm2, %v1618_v21 }
 0x1c4   : > { %v2516_v61 = vmax.f32 %v2414_v58, 0.0  ;;  %v2416_v62 = vpop.f32.mrb[106].mxu1 }
 0x1c5   : > { %v2657_v0 = vmax.f32 %v2656_v49, %v2515_v57  ;;  %v2523_v1 = vmax.f32 %v2416_v62, 0.0  ;;  %v2418_v2 = vpop.f32.mrb[107].mxu1  ;;  %v3560_v29 = vpop.f32.mrb[64].mxu0 }
 0x1c6   : > { %v2676_v3 = vmax.f32 %v2675_v50, %v2516_v61  ;;  %v2524_v4 = vmax.f32 %v2418_v2, 0.0  ;;  %v1623_v36 = vmax.f32 %v3560_v29, 0.0  ;;  %v1302_v37 = vpop.f32.mrb[65].mxu0  ;;  %v2718_v61 = vrot.slane %v2696_v33, %v4486_v52 }
 0x1c7   : > { %v2658_v5 = vmax.f32 %v2657_v0, %v2523_v1  ;;  %v1621_v38 = vmax.f32 %v1302_v37, 0.0  ;;  %v3561_v39 = vpop.f32.mrb[66].mxu0 }
 0x1c8   : > { %v2677_v7 = vmax.f32 %v2676_v3, %v2524_v4  ;;  %1752 = vst.msk [vmem:[%s4418_s10 + $0x210] sm:$0xff] %vm1685_vm2, %v1623_v36  ;;  %v1624_v41 = vmax.f32 %v3561_v39, 0.0  ;;  %v1305_v42 = vpop.f32.mrb[67].mxu0 }
 0x1c9   : > { %1750 = vst.msk [vmem:[%s4418_s10 + $0x200] sm:$0xff] %vm1685_vm2, %v1621_v38  ;;  %v1622_v6 = vmax.f32 %v1305_v42, 0.0 }
 0x1ca   : > { %v2422_v13 = vpop.f32.mrb[108].mxu1  ;;  %1753 = vst.msk [vmem:[%s4418_s10 + $0x218] sm:$0xff] %vm1685_vm2, %v1624_v41 }
 0x1cb   : > { %v2531_v16 = vmax.f32 %v2422_v13, 0.0  ;;  %v2424_v17 = vpop.f32.mrb[109].mxu1  ;;  %1751 = vst.msk [vmem:[%s4418_s10 + $0x208] sm:$0xff] %vm1685_vm2, %v1622_v6 }
 0x1cc   : > { %v2532_v19 = vmax.f32 %v2424_v17, 0.0  ;;  %v2426_v20 = vpop.f32.mrb[110].mxu1 }
 0x1cd   : > { %v2659_v22 = vsel %vm2544_vm1, %v2531_v16, -inf  ;;  %v2427_v23 = vpop.f32.mrb[111].mxu1  ;;  %v3564_v49 = vpop.f32.mrb[68].mxu0 }
 0x1ce   : > { %v2660_v24 = vmax.f32 %v2658_v5, %v2659_v22  ;;  %v2678_v18 = vsel %vm2544_vm1, %v2532_v19, -inf  ;;  %v1627_v51 = vmax.f32 %v3564_v49, 0.0  ;;  %v1318_v53 = vpop.f32.mrb[69].mxu0 }
 0x1cf   : > { %v2679_v26 = vmax.f32 %v2677_v7, %v2678_v18  ;;  %v1625_v55 = vmax.f32 %v1318_v53, 0.0  ;;  %v3565_v56 = vpop.f32.mrb[70].mxu0 }
 0x1d0   : > { %v2661_v27 = vrot.slane %v2660_v24, 4  ;;  %1756 = vst.msk [vmem:[%s4418_s10 + $0x230] sm:$0xff] %vm1685_vm2, %v1627_v51  ;;  %v1628_v57 = vmax.f32 %v3565_v56, 0.0  ;;  %v1321_v58 = vpop.f32.mrb[71].mxu0 }
 0x1d1   : > { %v2680_v30 = vrot.slane %v2679_v26, 4  ;;  %1754 = vst.msk [vmem:[%s4418_s10 + $0x220] sm:$0xff] %vm1685_vm2, %v1625_v55  ;;  %v1626_v59 = vmax.f32 %v1321_v58, 0.0 }
 0x1d2   : > { %v2662_v32 = vmax.f32 %v2660_v24, %v2661_v27  ;;  %1757 = vst.msk [vmem:[%s4418_s10 + $0x238] sm:$0xff] %vm1685_vm2, %v1628_v57 }
 0x1d3   : > { %v2681_v40 = vmax.f32 %v2679_v26, %v2680_v30  ;;  %1755 = vst.msk [vmem:[%s4418_s10 + $0x228] sm:$0xff] %vm1685_vm2, %v1626_v59 }
 0x1d4   : > { %v2663_v44 = vrot.slane %v2662_v32, 2 }
 0x1d5   : > { %v2682_v45 = vrot.slane %v2681_v40, 2  ;;  %v3568_v63 = vpop.f32.mrb[72].mxu0 }
 0x1d6   : > { %v2664_v46 = vmax.f32 %v2662_v32, %v2663_v44  ;;  %v1631_v0 = vmax.f32 %v3568_v63, 0.0  ;;  %v1334_v1 = vpop.f32.mrb[73].mxu0 }
 0x1d7   : > { %v2683_v47 = vmax.f32 %v2681_v40, %v2682_v45  ;;  %v1629_v3 = vmax.f32 %v1334_v1, 0.0  ;;  %v3569_v4 = vpop.f32.mrb[74].mxu0 }
 0x1d8   : > { %v2665_v48 = vrot.slane %v2664_v46, 1  ;;  %1760 = vst.msk [vmem:[%s4418_s10 + $0x250] sm:$0xff] %vm1685_vm2, %v1631_v0  ;;  %v1632_v5 = vmax.f32 %v3569_v4, 0.0  ;;  %v1337_v7 = vpop.f32.mrb[75].mxu0 }
 0x1d9   : > { %v2684_v50 = vrot.slane %v2683_v47, 1  ;;  %1758 = vst.msk [vmem:[%s4418_s10 + $0x240] sm:$0xff] %vm1685_vm2, %v1629_v3  ;;  %v1630_v33 = vmax.f32 %v1337_v7, 0.0 }
 0x1da   : > { %v2666_v54 = vmax.f32 %v2664_v46, %v2665_v48  ;;  %1761 = vst.msk [vmem:[%s4418_s10 + $0x258] sm:$0xff] %vm1685_vm2, %v1632_v5 }
 0x1db   : > { %v2685_v34 = vmax.f32 %v2683_v47, %v2684_v50  ;;  %1759 = vst.msk [vmem:[%s4418_s10 + $0x248] sm:$0xff] %vm1685_vm2, %v1630_v33 }
 0x1dd   : > { %v2697_v60 = vcombine.low %v2666_v54, %v2685_v34  ;;  %3036 = vmatprep.mubr.f32.mxu1 %v2685_v34  ;;  %v3572_v9 = vpop.f32.mrb[76].mxu0 }
 0x1de   : > { %3037 = vmatmul.mubr.f32.vlgmr.msra.gmra.mrb[112].mxu1 %v2666_v54  ;;  %v1635_v10 = vmax.f32 %v3572_v9, 0.0  ;;  %v1350_v12 = vpop.f32.mrb[77].mxu0 }
 0x1df   : > { %v2725_v62 = vrot.slane %v2697_v60, %v4486_v52  ;;  %v3573_v28 = vpop.f32.mrb[78].mxu0 }
 0x1e0   : > { %1764 = vst.msk [vmem:[%s4418_s10 + $0x270] sm:$0xff] %vm1685_vm2, %v1635_v10  ;;  %v1636_v11 = vmax.f32 %v3573_v28, 0.0  ;;  %v1353_v13 = vpop.f32.mrb[79].mxu0 }
 0x1e1   : > { %v2727_v2 = vcombine.low %v2718_v61, %v2725_v62  ;;  %v1634_v14 = vmax.f32 %v1353_v13, 0.0 }
 0x1e2   : > { %1765 = vst.msk [vmem:[%s4418_s10 + $0x278] sm:$0xff] %vm1685_vm2, %v1636_v11 }
 0x1e3   : > { %v2741_v35 = vrot.slane %v2727_v2, %v4486_v52  ;;  %v1633_v52 = vmax.f32 %v1350_v12, 0.0  ;;  %1763 = vst.msk [vmem:[%s4418_s10 + $0x268] sm:$0xff] %vm1685_vm2, %v1634_v14 }
 0x1e5   : > { %v2742_v8 = vcombine.low %v2734_v25, %v2741_v35  ;;  %1762 = vst.msk [vmem:[%s4418_s10 + $0x260] sm:$0xff] %vm1685_vm2, %v1633_v52  ;;  %v3576_v15 = vpop.f32.mrb[80].mxu0 }
 0x1e6   : > { %v1639_v16 = vmax.f32 %v3576_v15, 0.0  ;;  %v1366_v17 = vpop.f32.mrb[81].mxu0 }
 0x1e7   : > { %2744 = vst [vmem:[%s4668_s23] sm:$0xff] %v2742_v8  ;;  %v1637_v31 = vmax.f32 %v1366_v17, 0.0  ;;  %v3577_v43 = vpop.f32.mrb[82].mxu0 }
 0x1e8   : > { %1768 = vst.msk [vmem:[%s4418_s10 + $0x290] sm:$0xff] %vm1685_vm2, %v1639_v16  ;;  %v1640_v19 = vmax.f32 %v3577_v43, 0.0  ;;  %v1369_v20 = vpop.f32.mrb[83].mxu0 }
 0x1e9   : > { %1766 = vst.msk [vmem:[%s4418_s10 + $0x280] sm:$0xff] %vm1685_vm2, %v1637_v31  ;;  %v1638_v21 = vmax.f32 %v1369_v20, 0.0 }
 0x1ea   : > { %1769 = vst.msk [vmem:[%s4418_s10 + $0x298] sm:$0xff] %vm1685_vm2, %v1640_v19 }
 0x1eb   : > { %1767 = vst.msk [vmem:[%s4418_s10 + $0x288] sm:$0xff] %vm1685_vm2, %v1638_v21 }
 0x1ed   : > { %v3580_v22 = vpop.f32.mrb[84].mxu0 }
 0x1ee   : > { %v1643_v23 = vmax.f32 %v3580_v22, 0.0  ;;  %v1382_v24 = vpop.f32.mrb[85].mxu0 }
 0x1ef   : > { %v1641_v18 = vmax.f32 %v1382_v24, 0.0  ;;  %v3581_v26 = vpop.f32.mrb[86].mxu0 }
 0x1f0   : > { %1772 = vst.msk [vmem:[%s4418_s10 + $0x2b0] sm:$0xff] %vm1685_vm2, %v1643_v23  ;;  %v1644_v27 = vmax.f32 %v3581_v26, 0.0  ;;  %v1385_v29 = vpop.f32.mrb[87].mxu0 }
 0x1f1   : > { %1770 = vst.msk [vmem:[%s4418_s10 + $0x2a0] sm:$0xff] %vm1685_vm2, %v1641_v18  ;;  %v1642_v30 = vmax.f32 %v1385_v29, 0.0 }
 0x1f2   : > { %1773 = vst.msk [vmem:[%s4418_s10 + $0x2b8] sm:$0xff] %vm1685_vm2, %v1644_v27 }
 0x1f3   : > { %1771 = vst.msk [vmem:[%s4418_s10 + $0x2a8] sm:$0xff] %vm1685_vm2, %v1642_v30 }
 0x1f5   : > { %v3584_v36 = vpop.f32.mrb[88].mxu0 }
 0x1f6   : > { %v1647_v37 = vmax.f32 %v3584_v36, 0.0  ;;  %v1398_v32 = vpop.f32.mrb[89].mxu0 }
 0x1f7   : > { %v1645_v38 = vmax.f32 %v1398_v32, 0.0  ;;  %v3585_v39 = vpop.f32.mrb[90].mxu0 }
 0x1f8   : > { %1776 = vst.msk [vmem:[%s4418_s10 + $0x2d0] sm:$0xff] %vm1685_vm2, %v1647_v37  ;;  %v1648_v40 = vmax.f32 %v3585_v39, 0.0  ;;  %v1401_v41 = vpop.f32.mrb[91].mxu0 }
 0x1f9   : > { %1774 = vst.msk [vmem:[%s4418_s10 + $0x2c0] sm:$0xff] %vm1685_vm2, %v1645_v38  ;;  %v1646_v42 = vmax.f32 %v1401_v41, 0.0 }
 0x1fa   : > { %1777 = vst.msk [vmem:[%s4418_s10 + $0x2d8] sm:$0xff] %vm1685_vm2, %v1648_v40 }
 0x1fb   : > { %1775 = vst.msk [vmem:[%s4418_s10 + $0x2c8] sm:$0xff] %vm1685_vm2, %v1646_v42 }
 0x1fd   : > { %v3588_v44 = vpop.f32.mrb[92].mxu0 }
 0x1fe   : > { %v1651_v6 = vmax.f32 %v3588_v44, 0.0  ;;  %v1414_v45 = vpop.f32.mrb[93].mxu0 }
 0x1ff   : > { %v1649_v46 = vmax.f32 %v1414_v45, 0.0  ;;  %v3589_v47 = vpop.f32.mrb[94].mxu0 }
 0x200   : > { %1780 = vst.msk [vmem:[%s4418_s10 + $0x2f0] sm:$0xff] %vm1685_vm2, %v1651_v6  ;;  %v1652_v48 = vmax.f32 %v3589_v47, 0.0  ;;  %v1417_v49 = vpop.f32.mrb[95].mxu0 }
 0x201   : > { %1778 = vst.msk [vmem:[%s4418_s10 + $0x2e0] sm:$0xff] %vm1685_vm2, %v1649_v46  ;;  %v1650_v50 = vmax.f32 %v1417_v49, 0.0 }
 0x202   : > { %1781 = vst.msk [vmem:[%s4418_s10 + $0x2f8] sm:$0xff] %vm1685_vm2, %v1652_v48 }
 0x203   : > { %1779 = vst.msk [vmem:[%s4418_s10 + $0x2e8] sm:$0xff] %vm1685_vm2, %v1650_v50 }
 0x205   : > { %v3592_v51 = vpop.f32.mrb[96].mxu0 }
 0x206   : > { %v1655_v53 = vmax.f32 %v3592_v51, 0.0  ;;  %v1430_v54 = vpop.f32.mrb[97].mxu0 }
 0x207   : > { %v1653_v55 = vmax.f32 %v1430_v54, 0.0  ;;  %v3593_v56 = vpop.f32.mrb[98].mxu0 }
 0x208   : > { %1784 = vst.msk [vmem:[%s4418_s10 + $0x310] sm:$0xff] %vm1685_vm2, %v1655_v53  ;;  %v1656_v34 = vmax.f32 %v3593_v56, 0.0  ;;  %v1433_v57 = vpop.f32.mrb[99].mxu0 }
 0x209   : > { %1782 = vst.msk [vmem:[%s4418_s10 + $0x300] sm:$0xff] %vm1685_vm2, %v1653_v55  ;;  %v1654_v58 = vmax.f32 %v1433_v57, 0.0 }
 0x20a   : > { %1785 = vst.msk [vmem:[%s4418_s10 + $0x318] sm:$0xff] %vm1685_vm2, %v1656_v34 }
 0x20b   : > { %1783 = vst.msk [vmem:[%s4418_s10 + $0x308] sm:$0xff] %vm1685_vm2, %v1654_v58 }
 0x20d   : > { %v3596_v59 = vpop.f32.mrb[100].mxu0 }
 0x20e   : > { %v1659_v60 = vmax.f32 %v3596_v59, 0.0  ;;  %v1446_v61 = vpop.f32.mrb[101].mxu0 }
 0x20f   : > { %v1657_v62 = vmax.f32 %v1446_v61, 0.0  ;;  %v3597_v63 = vpop.f32.mrb[102].mxu0 }
 0x210   : > { %1788 = vst.msk [vmem:[%s4418_s10 + $0x330] sm:$0xff] %vm1685_vm2, %v1659_v60  ;;  %v1660_v0 = vmax.f32 %v3597_v63, 0.0  ;;  %v1449_v1 = vpop.f32.mrb[103].mxu0 }
 0x211   : > { %1786 = vst.msk [vmem:[%s4418_s10 + $0x320] sm:$0xff] %vm1685_vm2, %v1657_v62  ;;  %v1658_v2 = vmax.f32 %v1449_v1, 0.0 }
 0x212   : > { %1789 = vst.msk [vmem:[%s4418_s10 + $0x338] sm:$0xff] %vm1685_vm2, %v1660_v0 }
 0x213   : > { %1787 = vst.msk [vmem:[%s4418_s10 + $0x328] sm:$0xff] %vm1685_vm2, %v1658_v2 }
 0x215   : > { %v3600_v3 = vpop.f32.mrb[104].mxu0 }
 0x216   : > { %v1663_v4 = vmax.f32 %v3600_v3, 0.0  ;;  %v1462_v5 = vpop.f32.mrb[105].mxu0 }
 0x217   : > { %v1661_v7 = vmax.f32 %v1462_v5, 0.0  ;;  %v3601_v25 = vpop.f32.mrb[106].mxu0 }
 0x218   : > { %1792 = vst.msk [vmem:[%s4418_s10 + $0x350] sm:$0xff] %vm1685_vm2, %v1663_v4  ;;  %v1664_v35 = vmax.f32 %v3601_v25, 0.0  ;;  %v1465_v33 = vpop.f32.mrb[107].mxu0 }
 0x219   : > { %1790 = vst.msk [vmem:[%s4418_s10 + $0x340] sm:$0xff] %vm1685_vm2, %v1661_v7  ;;  %v1662_v8 = vmax.f32 %v1465_v33, 0.0 }
 0x21a   : > { %1793 = vst.msk [vmem:[%s4418_s10 + $0x358] sm:$0xff] %vm1685_vm2, %v1664_v35 }
 0x21b   : > { %1791 = vst.msk [vmem:[%s4418_s10 + $0x348] sm:$0xff] %vm1685_vm2, %v1662_v8 }
 0x21d   : > { %v3604_v9 = vpop.f32.mrb[108].mxu0 }
 0x21e   : > { %v1667_v10 = vmax.f32 %v3604_v9, 0.0  ;;  %v1478_v12 = vpop.f32.mrb[109].mxu0 }
 0x21f   : > { %v1665_v52 = vmax.f32 %v1478_v12, 0.0  ;;  %v3605_v28 = vpop.f32.mrb[110].mxu0 }
 0x220   : > { %1796 = vst.msk [vmem:[%s4418_s10 + $0x370] sm:$0xff] %vm1685_vm2, %v1667_v10  ;;  %v1668_v11 = vmax.f32 %v3605_v28, 0.0  ;;  %v1481_v13 = vpop.f32.mrb[111].mxu0 }
 0x221   : > { %1794 = vst.msk [vmem:[%s4418_s10 + $0x360] sm:$0xff] %vm1685_vm2, %v1665_v52  ;;  %v1666_v14 = vmax.f32 %v1481_v13, 0.0 }
 0x222   : > { %1797 = vst.msk [vmem:[%s4418_s10 + $0x378] sm:$0xff] %vm1685_vm2, %v1668_v11 }
 0x223   : > { %1795 = vst.msk [vmem:[%s4418_s10 + $0x368] sm:$0xff] %vm1685_vm2, %v1666_v14 }
 0x225   : > { %v3608_v15 = vpop.f32.mrb[112].mxu0 }
 0x226   : > { %v1671_v16 = vmax.f32 %v3608_v15, 0.0  ;;  %v1494_v17 = vpop.f32.mrb[113].mxu0 }
 0x227   : > { %v3609_v31 = vpop.f32.mrb[114].mxu0  ;;  %v1669_v19 = vmax.f32 %v1494_v17, 0.0 }
 0x228   : > { %1800 = vst.msk [vmem:[%s4418_s10 + $0x390] sm:$0xff] %vm1685_vm2, %v1671_v16  ;;  %v1497_v43 = vpop.f32.mrb[115].mxu0  ;;  %v1672_v20 = vmax.f32 %v3609_v31, 0.0 }
 0x229   : > { %v1670_v21 = vmax.f32 %v1497_v43, 0.0  ;;  %1798 = vst.msk [vmem:[%s4418_s10 + $0x380] sm:$0xff] %vm1685_vm2, %v1669_v19 }
 0x22a   : > { %1801 = vst.msk [vmem:[%s4418_s10 + $0x398] sm:$0xff] %vm1685_vm2, %v1672_v20 }
 0x22b   : > { %1799 = vst.msk [vmem:[%s4418_s10 + $0x388] sm:$0xff] %vm1685_vm2, %v1670_v21 }
 0x22d   : > { %v3612_v22 = vpop.f32.mrb[116].mxu0 }
 0x22e   : > { %v1510_v23 = vpop.f32.mrb[117].mxu0  ;;  %v1675_v26 = vmax.f32 %v3612_v22, 0.0 }
 0x22f   : > { %v3613_v24 = vpop.f32.mrb[118].mxu0  ;;  %v1673_v27 = vmax.f32 %v1510_v23, 0.0 }
 0x230   : > { %v1513_v18 = vpop.f32.mrb[119].mxu0  ;;  %v1676_v29 = vmax.f32 %v3613_v24, 0.0  ;;  %1804 = vst.msk [vmem:[%s4418_s10 + $0x3b0] sm:$0xff] %vm1685_vm2, %v1675_v26 }
 0x231   : > { %v1674_v30 = vmax.f32 %v1513_v18, 0.0  ;;  %1802 = vst.msk [vmem:[%s4418_s10 + $0x3a0] sm:$0xff] %vm1685_vm2, %v1673_v27 }
 0x232   : > { %1805 = vst.msk [vmem:[%s4418_s10 + $0x3b8] sm:$0xff] %vm1685_vm2, %v1676_v29 }
 0x233   : > { %1803 = vst.msk [vmem:[%s4418_s10 + $0x3a8] sm:$0xff] %vm1685_vm2, %v1674_v30 }
 0x235   : > { %v3616_v36 = vpop.f32.mrb[120].mxu0 }
 0x236   : > { %v1526_v37 = vpop.f32.mrb[121].mxu0  ;;  %v1679_v39 = vmax.f32 %v3616_v36, 0.0 }
 0x237   : > { %v3617_v32 = vpop.f32.mrb[122].mxu0  ;;  %v1677_v40 = vmax.f32 %v1526_v37, 0.0 }
 0x238   : > { %v1529_v38 = vpop.f32.mrb[123].mxu0  ;;  %v1680_v41 = vmax.f32 %v3617_v32, 0.0  ;;  %1808 = vst.msk [vmem:[%s4418_s10 + $0x3d0] sm:$0xff] %vm1685_vm2, %v1679_v39 }
 0x239   : > { %v1678_v42 = vmax.f32 %v1529_v38, 0.0  ;;  %1806 = vst.msk [vmem:[%s4418_s10 + $0x3c0] sm:$0xff] %vm1685_vm2, %v1677_v40 }
 0x23a   : > { %1809 = vst.msk [vmem:[%s4418_s10 + $0x3d8] sm:$0xff] %vm1685_vm2, %v1680_v41 }
 0x23b   : > { %1807 = vst.msk [vmem:[%s4418_s10 + $0x3c8] sm:$0xff] %vm1685_vm2, %v1678_v42 }
 0x23d   : > { %v3620_v44 = vpop.f32.mrb[124].mxu0 }
 0x23e   : > { %v1683_v6 = vmax.f32 %v3620_v44, 0.0  ;;  %v1542_v45 = vpop.f32.mrb[125].mxu0 }
 0x23f   : > { %v1681_v46 = vmax.f32 %v1542_v45, 0.0  ;;  %v3621_v47 = vpop.f32.mrb[126].mxu0 }
 0x240   : > { %1812 = vst.msk [vmem:[%s4418_s10 + $0x3f0] sm:$0xff] %vm1685_vm2, %v1683_v6  ;;  %v1684_v48 = vmax.f32 %v3621_v47, 0.0  ;;  %v1545_v49 = vpop.f32.mrb[127].mxu0 }
 0x241   : > { %1810 = vst.msk [vmem:[%s4418_s10 + $0x3e0] sm:$0xff] %vm1685_vm2, %v1681_v46  ;;  %v1682_v50 = vmax.f32 %v1545_v49, 0.0 }
 0x242   : > { %1813 = vst.msk [vmem:[%s4418_s10 + $0x3f8] sm:$0xff] %vm1685_vm2, %v1684_v48 }
 0x243   : > { %1811 = vst.msk [vmem:[%s4418_s10 + $0x3e8] sm:$0xff] %vm1685_vm2, %v1682_v50 }
 0x244   : > { %3784 = shalt.err (!%p3781_p3)
}
 0x245   : > { %s3785_s10 = scalar_lea.hbm %s4780_s17, 128  ;;  %s3789_s26 = scalar_lea.hbm %s4859_s8, 256 }
 0x246   : > { %p3786_p4 = scmp.ne.s32.totalorder %s4780_s17, %s3785_s10  ;;  %p3790_p9 = scmp.lt.u32.totalorder %s4780_s17, %s4859_s8 }
 0x247   : > { %p3791_p10 = scmp.lt.u32.totalorder %s3789_s26, %s3785_s10  ;;  %p3793_p12 = scmp.lt.u32.totalorder %s3785_s10, %s4780_s17 }
 0x248   : > { %p3787_p7 = pnand %p3786_p4, %p3954_p5 }
 0x249   : > { %p3792_p11 = por %p3791_p10, %p3790_p9 }
 0x24a   : > { %p3788_p8 = pneg %p3787_p7 }
 0x24b   : > { %p3794_p13 = por %p3793_p12, %p3792_p11 }
 0x24d   : > { %p3795_p0 = pnand %p3794_p13, %p3788_p8 }
 0x24f   : > { %3798 = shalt.err (!%p3795_p0)
}
 0x250   : > { %3648 = dma.vmem_to_hbm [thread:$0]  (%p3954_p5), %s3091_s25, 128, %s4780_s17, %s3060_s13   ;;  %v2761_v51 = vld [vmem:[%s4856_s5] sm:$0x1]  ;;  %vm3048_vm3 = vcmask 106496  }
 0x251   : > { %s3414_s22 = sshll.u32 %s3937_s9, 4  ;;  %s316_s10 = scalar_lea.vmem [#allocation2], %s4647_s21 }
 0x252   : > { %s3073_s23 = sshll.u32 %s316_s10, 4  ;;  %s4808_s13 = scalar_lea.hbm %s4857_s6, %s3414_s22  ;;  %s4810_s23 = int_to_ptr.vmem [resolvable:$true] %s3073_s23 }
 0x253   : > { %s3051_s24 = scalar_lea.sflag [#allocation3], %s4647_s21  ;;  %s3799_s26 = scalar_lea.vmem %s4810_s23, 16 }
 0x254   : > { %p3800_p1 = scmp.ne.s32.totalorder %s4810_s23, %s3799_s26  ;;  %s3870_s9 = smov [#allocation2]  }
 0x255   : > { %s3803_s12 = sshll.u32 %s3870_s9, 4  ;;  %s3804_s12 = int_to_ptr.vmem [resolvable:$false] %s3803_s12 }
 0x256   : > { %p3801_p2 = pnand %p3800_p1, %p3954_p5  ;;  %s3805_s19 = scalar_lea.vmem %s3804_s12, 32 }
 0x257   : > { %p3806_p4 = scmp.lt.s32.totalorder %s4810_s23, %s3804_s12  ;;  %p3807_p7 = scmp.lt.s32.totalorder %s3805_s19, %s3799_s26 }
 0x258   : > { %p3802_p3 = pneg %p3801_p2 }
 0x259   : > { %p3808_p8 = por %p3807_p7, %p3806_p4 }
 0x25b   : > { %p3809_p9 = pnand %p3808_p8, %p3802_p3 }
 0x2b1   : > { %v3038_v53 = vpop.f32.mrb[112].mxu1 }
 0x2b2   : > { %v3638_v54 = vadd.f32 %v3038_v53, %v2761_v51  ;;  %v3040_v55 = vpop.f32.mrb[113].mxu1 }
 0x2b4   : > { %v3042_v56 = vsub.f32 0.0, %v3638_v54 }
 0x2b6   : > { %v3043_v34 = vmul.f32 1.442695, %v3042_v56 }
 0x2b8   : > { %3767 = vpow2.f32 %v3043_v34 }
 0x2c2   : > { %v3768_v57 = vpop.eup %3767 }
 0x2c3   : > { %v3045_v58 = vadd.f32 1.0, %v3768_v57 }
 0x2c5   : > { %3769 = vrcp.f32 %v3045_v58 }
 0x2cf   : > { %v3770_v59 = vpop.eup %3769 }
 0x2d0   : > { %3049 = vst.msk [vmem:[%s316_s10] sm:$0x1] %vm3048_vm3, %v3770_v59 }
 0x2d1   : > { %3812 = shalt.err (!%p3809_p9)
}
 0x2d2   : > { %s3813_s21 = scalar_lea.hbm %s4808_s13, 16  ;;  %s3817_s22 = scalar_lea.hbm %s4857_s6, 32 }
 0x2d3   : > { %p3814_p10 = scmp.ne.s32.totalorder %s4808_s13, %s3813_s21  ;;  %p3818_p13 = scmp.lt.u32.totalorder %s4808_s13, %s4857_s6 }
 0x2d4   : > { %p3819_p0 = scmp.lt.u32.totalorder %s3817_s22, %s3813_s21  ;;  %p3821_p2 = scmp.lt.u32.totalorder %s3813_s21, %s4808_s13 }
 0x2d5   : > { %p3815_p11 = pnand %p3814_p10, %p3954_p5 }
 0x2d6   : > { %p3820_p1 = por %p3819_p0, %p3818_p13 }
 0x2d7   : > { %p3816_p12 = pneg %p3815_p11 }
 0x2d8   : > { %p3822_p3 = por %p3821_p2, %p3820_p1 }
 0x2da   : > { %p3823_p4 = pnand %p3822_p3, %p3816_p12 }
 0x2dc   : > { %3826 = shalt.err (!%p3823_p4)
}
 0x2dd   : > { %3647 = dma.vmem_to_hbm [thread:$0]  (%p3954_p5), %s4810_s23, 16, %s4808_s13, %s3051_s24  }
 0x2de PF: > { %p3658_p7 = scmp.ge.s32.totalorder %s3865_s30, 2  ;;  %s3102_s17 = sand.u32 1, %s3853_s27  }
 0x2df   : > { %s3103_s26 = scalar_lea.sflag [#allocation3], %s3102_s17 }
 0x2e0   : > { %p3652_p8 = pnand %p3658_p7, %p3958_p6 }
 0x2e2   : > { %3844 = dma.done.wait (!%p3652_p8), %s3103_s26, 16  }
 0x2e3   : > { %3846 = vsyncadd (!%p3652_p8), %s3103_s26, 4294967280  ;;  %s3119_s9 = scalar_lea.sflag [#allocation5], %s3102_s17 }
 0x2e4   : > { %3848 = dma.done.wait (!%p3652_p8), %s3119_s9, 128  }
 0x2e5   : > { %3850 = vsyncadd (!%p3652_p8), %s3119_s9, 4294967168  ;;  %p22_p5 = scmp.ge.s32.totalorder %s3941_s11, 4   ;;  %s4862_s27 = smov %s3857_s28 }
 0x2e6   : > { %s4863_s28 = smov %s3861_s29  ;;  %s4864_s29 = smov %s3952_s14 }
 0x2e7   : > { %s4865_s30 = smov %s3941_s11  ;;  %24 = sbr.rel (!%p22_p5) target bundleno = 5 (0x5), region = 111 }
 0x2ee   :  { %3124 = vsyncpa [#allocation3], 1 }
 0x2ef   :  { %3126 = vsyncpa [#allocation3 + $0x1], 1 }
 0x2f0   :  { %3127 = vsyncpa [#allocation5], 1 }
 0x2f1   :  { %3129 = vsyncpa [#allocation5 + $0x1], 1 }

</bundles_post_ra>
